<compile_context>
chip_gen: v7x
topology: tpu7x:2x2x1
jax: 0.10.0
libtpu: 0.0.40
codegen_flags: <defaults>
</compile_context>

<pallas_src>
import jax
import jax.numpy as jnp
import numpy as np
from jax import lax
from jax.experimental import pallas as pl
from jax.experimental.pallas import tpu as pltpu

_EPS = 1e-5  # nn.InstanceNorm2d default eps (affine=False, no running stats)


def _resblock_kernel(x_ref, w1_ref, w2_ref, o_ref):
    # x_ref block: (1, H, W, C)
    _, H, W, C = x_ref.shape
    HW = H * W
    inv_n = 1.0 / float(HW)

    def conv3x3(t, w_ref):
        """t: (H, W, C) bf16 -> 3x3 'same' conv (reflect pad), (H*W, C) f32.

        Bias is intentionally omitted (cancelled by the following
        InstanceNorm, which subtracts the per-channel mean).
        """
        # Reflect-pad along H (rows 1 and H-2): one sublane-contiguous concat.
        th = jnp.concatenate([t[1:2], t, t[H - 2:H - 1]], axis=0)        # (H+2, W, C)
        # Three column-shifted copies with the W-reflection folded in.
        c0 = jnp.concatenate([th[:, 1:2], th[:, :W - 1]], axis=1)        # reads w-1
        c2 = jnp.concatenate([th[:, 1:W], th[:, W - 2:W - 1]], axis=1)   # reads w+1
        cols = (c0.reshape((H + 2) * W, C),
                th.reshape((H + 2) * W, C),
                c2.reshape((H + 2) * W, C))

        # TODO(synk): for very small C (< 128) a single (H*W, 9*C) @ (9*C, C)
        # contraction would use the MXU K dimension better than 9 thin dots.
        acc = jnp.zeros((HW, C), jnp.float32)
        for kw in range(3):
            flat = cols[kw]
            for kh in range(3):
                # Row slice at offset kh*W: sublane-aligned (no relayout) when
                # W is a multiple of the sublane tile; correct regardless.
                patch = flat[kh * W:kh * W + HW, :]
                acc = acc + jnp.dot(patch, w_ref[kh * 3 + kw],
                                    preferred_element_type=jnp.float32)
        return acc                                                       # (H*W, C) f32

    def instance_norm(y):
        # Single-pass per-channel statistics over the flattened spatial axis.
        s = jnp.sum(y, axis=0, keepdims=True)
        ss = jnp.sum(y * y, axis=0, keepdims=True)
        mean = s * inv_n
        var = jnp.maximum(ss * inv_n - mean * mean, 0.0)
        return (y - mean) * lax.rsqrt(var + _EPS)

    xb = x_ref[0].astype(jnp.bfloat16)                  # bf16 working copy only
    y = instance_norm(conv3x3(xb, w1_ref))              # (H*W, C) f32
    h = jnp.maximum(y, 0.0).astype(jnp.bfloat16).reshape(H, W, C)
    y = instance_norm(conv3x3(h, w2_ref))               # (H*W, C) f32

    # Residual add: re-read x here instead of keeping an f32 copy live above.
    o_ref[0] = (x_ref[0].astype(jnp.float32)
                + y.reshape(H, W, C)).astype(o_ref.dtype)


def residual_block(x_nchw, w1, b1, w2, b2):
    """x_nchw: (N, C, H, W); w*: (C, C, 3, 3) [PyTorch OIHW]; b*: (C,).

    b1/b2 are accepted for interface parity with nn.Conv2d but are not fed to
    the kernel: InstanceNorm2d(affine=False) removes any per-channel constant,
    so the conv biases cancel exactly.
    """
    del b1, b2
    N, C, H, W = x_nchw.shape
    assert H >= 2 and W >= 2, "ReflectionPad2d(1) requires H, W >= 2"

    x = jnp.transpose(x_nchw, (0, 2, 3, 1))             # NCHW -> NHWC

    # (Cout, Cin, kh, kw) -> (kh, kw, Cin, Cout) -> (9, Cin, Cout), bf16 for MXU
    w1r = jnp.transpose(w1, (2, 3, 1, 0)).reshape(9, C, C).astype(jnp.bfloat16)
    w2r = jnp.transpose(w2, (2, 3, 1, 0)).reshape(9, C, C).astype(jnp.bfloat16)

    # Explicit VMEM budget: double-buffered f32 in/out blocks + in-kernel
    # intermediates (3 bf16 shifted copies, f32 acc / activations). Clamped so
    # the scoped limit stays inside every generation's physical VMEM
    # (v7x has only 64 MiB per TensorCore).
    blk_bytes = H * W * C * 4
    interm_bytes = 3 * (H + 2) * W * C * 2 + 3 * H * W * C * 4
    vmem_bytes = int(min(max(4 * blk_bytes + interm_bytes + (1 << 20), 8 << 20),
                         48 << 20))

    flops = int(N * 2 * 2 * 9 * H * W * C * C)          # two 3x3 convs
    bytes_accessed = int(2 * N * H * W * C * x.dtype.itemsize + 2 * 9 * C * C * 2)

    # NOTE: grid is one image per step (batch axis "parallel"). For very large
    # images a spatial row-band grid axis (with IN stats carried in scratch and
    # a second normalization sweep) would improve DMA/compute overlap; with the
    # bf16 working set above, whole-image blocks fit comfortably for typical
    # CycleGAN residual-block shapes (C=256, H=W=64 -> ~35 MiB).
    out = pl.pallas_call(
        _resblock_kernel,
        out_shape=jax.ShapeDtypeStruct((N, H, W, C), x.dtype),
        grid_spec=pltpu.PrefetchScalarGridSpec(
            num_scalar_prefetch=0,
            grid=(N,),
            in_specs=[
                pl.BlockSpec((1, H, W, C), lambda n: (n, 0, 0, 0)),
                pl.BlockSpec((9, C, C), lambda n: (0, 0, 0)),
                pl.BlockSpec((9, C, C), lambda n: (0, 0, 0)),
            ],
            out_specs=pl.BlockSpec((1, H, W, C), lambda n: (n, 0, 0, 0)),
        ),
        compiler_params=pltpu.CompilerParams(
            dimension_semantics=("parallel",),
            vmem_limit_bytes=vmem_bytes),
        cost_estimate=pl.CostEstimate(
            flops=flops, transcendentals=0, bytes_accessed=bytes_accessed),
    )(x, w1r, w2r)

    return jnp.transpose(out, (0, 3, 1, 2))             # NHWC -> NCHW


# ---- pure-JAX reference (correctness check; matches the kernel's bf16
# ---- mixed-precision policy: bf16 conv operands, f32 accumulation) ----------
def _ref_forward(x, w1, b1, w2, b2):
    def conv(t, w, b):
        tp = jnp.pad(t, ((0, 0), (0, 0), (1, 1), (1, 1)), mode="reflect")
        y = lax.conv_general_dilated(
            tp.astype(jnp.bfloat16), w.astype(jnp.bfloat16), (1, 1), "VALID",
            dimension_numbers=("NCHW", "OIHW", "NCHW"),
            preferred_element_type=jnp.float32)
        return y + b[None, :, None, None]

    def inorm(t):
        m = t.mean(axis=(2, 3), keepdims=True)
        v = ((t - m) ** 2).mean(axis=(2, 3), keepdims=True)
        return (t - m) / jnp.sqrt(v + _EPS)

    y = jax.nn.relu(inorm(conv(x, w1, b1)))
    y = inorm(conv(y, w2, b2))
    return x + y


if __name__ == "__main__":
    N, C, H, W = 2, 4, 16, 16
    key = jax.random.PRNGKey(0)
    kx, kw1, kb1, kw2, kb2 = jax.random.split(key, 5)

    x = jax.random.normal(kx, (N, C, H, W), dtype=jnp.float32)
    # deterministic synthetic parameters (Conv2d(C, C, 3) with bias, x2)
    w1 = 0.1 * jax.random.normal(kw1, (C, C, 3, 3), dtype=jnp.float32)
    b1 = 0.1 * jax.random.normal(kb1, (C,), dtype=jnp.float32)
    w2 = 0.1 * jax.random.normal(kw2, (C, C, 3, 3), dtype=jnp.float32)
    b2 = 0.1 * jax.random.normal(kb2, (C,), dtype=jnp.float32)

    out = residual_block(x, w1, b1, w2, b2)
    out = jax.block_until_ready(out)

    ref = jax.block_until_ready(_ref_forward(x, w1, b1, w2, b2))
    np.testing.assert_allclose(np.asarray(out), np.asarray(ref),
                               rtol=1e-2, atol=1e-2)
    print("KERNEL_OK")
</pallas_src>

<mosaic_0001>
module attributes {stable_mosaic.version = 11 : i64} {
  func.func @_resblock_kernel(%arg0: i32, %arg1: memref<1x16x16x4xf32, #tpu.memory_space<vmem>>, %arg2: memref<9x4x4xbf16, #tpu.memory_space<vmem>>, %arg3: memref<9x4x4xbf16, #tpu.memory_space<vmem>>, %arg4: memref<1x16x16x4xf32, #tpu.memory_space<vmem>>) attributes {dimension_semantics = [#tpu.dimension_semantics<parallel>], iteration_bounds = array<i64: 2>, scalar_prefetch = 0 : i64, scratch_operands = 0 : i64, tpu.core_type = #tpu.core_type<tc>, window_params = [{transform_indices = @transform_0, window_bounds = array<i64: 1, 16, 16, 4>}, {pipeline_mode = #tpu.pipeline_mode<synchronous>, transform_indices = @transform_1, window_bounds = array<i64: 9, 4, 4>}, {pipeline_mode = #tpu.pipeline_mode<synchronous>, transform_indices = @transform_2, window_bounds = array<i64: 9, 4, 4>}, {transform_indices = @transform_3, window_bounds = array<i64: 1, 16, 16, 4>}]} {
    %c0 = arith.constant 0 : index
    %c0_0 = arith.constant 0 : index
    %c0_1 = arith.constant 0 : index
    %c0_2 = arith.constant 0 : index
    %0 = vector.load %arg1[%c0, %c0_0, %c0_1, %c0_2] : memref<1x16x16x4xf32, #tpu.memory_space<vmem>>, vector<1x16x16x4xf32>
    %1 = vector.shape_cast %0 : vector<1x16x16x4xf32> to vector<16x16x4xf32>
    %2 = arith.truncf %1 : vector<16x16x4xf32> to vector<16x16x4xbf16>
    %3 = vector.extract_strided_slice %2 {offsets = [1, 0, 0], sizes = [1, 16, 4], strides = [1, 1, 1]} : vector<16x16x4xbf16> to vector<1x16x4xbf16>
    %4 = vector.extract_strided_slice %2 {offsets = [14, 0, 0], sizes = [1, 16, 4], strides = [1, 1, 1]} : vector<16x16x4xbf16> to vector<1x16x4xbf16>
    %5 = tpu.concatenate %3, %2, %4 in 0 : vector<1x16x4xbf16>, vector<16x16x4xbf16>, vector<1x16x4xbf16> -> vector<18x16x4xbf16>
    %6 = vector.extract_strided_slice %5 {offsets = [0, 1, 0], sizes = [18, 1, 4], strides = [1, 1, 1]} : vector<18x16x4xbf16> to vector<18x1x4xbf16>
    %7 = vector.extract_strided_slice %5 {offsets = [0, 0, 0], sizes = [18, 15, 4], strides = [1, 1, 1]} : vector<18x16x4xbf16> to vector<18x15x4xbf16>
    %8 = tpu.concatenate %6, %7 in 1 : vector<18x1x4xbf16>, vector<18x15x4xbf16> -> vector<18x16x4xbf16>
    %9 = vector.extract_strided_slice %5 {offsets = [0, 1, 0], sizes = [18, 15, 4], strides = [1, 1, 1]} : vector<18x16x4xbf16> to vector<18x15x4xbf16>
    %10 = vector.extract_strided_slice %5 {offsets = [0, 14, 0], sizes = [18, 1, 4], strides = [1, 1, 1]} : vector<18x16x4xbf16> to vector<18x1x4xbf16>
    %11 = tpu.concatenate %9, %10 in 1 : vector<18x15x4xbf16>, vector<18x1x4xbf16> -> vector<18x16x4xbf16>
    %12 = vector.shape_cast %8 : vector<18x16x4xbf16> to vector<288x4xbf16>
    %13 = vector.shape_cast %5 : vector<18x16x4xbf16> to vector<288x4xbf16>
    %14 = vector.shape_cast %11 : vector<18x16x4xbf16> to vector<288x4xbf16>
    %cst = arith.constant 0.000000e+00 : f32
    %15 = vector.broadcast %cst : f32 to vector<256x4xf32>
    %16 = vector.extract_strided_slice %12 {offsets = [0, 0], sizes = [256, 4], strides = [1, 1]} : vector<288x4xbf16> to vector<256x4xbf16>
    %c0_3 = arith.constant 0 : index
    %c0_4 = arith.constant 0 : index
    %c0_5 = arith.constant 0 : index
    %17 = vector.load %arg2[%c0_3, %c0_4, %c0_5] : memref<9x4x4xbf16, #tpu.memory_space<vmem>>, vector<1x4x4xbf16>
    %18 = vector.shape_cast %17 : vector<1x4x4xbf16> to vector<4x4xbf16>
    %cst_6 = arith.constant dense<0.000000e+00> : vector<256x4xf32>
    %19 = tpu.matmul %16, %18, %cst_6 {dimension_numbers = #tpu.dot_dimension_numbers<[1], [0], [0], [1], [0, 0, 1, 1], [], []>} : vector<256x4xbf16>, vector<4x4xbf16>, vector<256x4xf32> -> vector<256x4xf32>
    %20 = arith.addf %15, %19 : vector<256x4xf32>
    %21 = vector.extract_strided_slice %12 {offsets = [16, 0], sizes = [256, 4], strides = [1, 1]} : vector<288x4xbf16> to vector<256x4xbf16>
    %c3 = arith.constant 3 : index
    %c0_7 = arith.constant 0 : index
    %c0_8 = arith.constant 0 : index
    %22 = vector.load %arg2[%c3, %c0_7, %c0_8] : memref<9x4x4xbf16, #tpu.memory_space<vmem>>, vector<1x4x4xbf16>
    %23 = vector.shape_cast %22 : vector<1x4x4xbf16> to vector<4x4xbf16>
    %cst_9 = arith.constant dense<0.000000e+00> : vector<256x4xf32>
    %24 = tpu.matmul %21, %23, %cst_9 {dimension_numbers = #tpu.dot_dimension_numbers<[1], [0], [0], [1], [0, 0, 1, 1], [], []>} : vector<256x4xbf16>, vector<4x4xbf16>, vector<256x4xf32> -> vector<256x4xf32>
    %25 = arith.addf %20, %24 : vector<256x4xf32>
    %26 = vector.extract_strided_slice %12 {offsets = [32, 0], sizes = [256, 4], strides = [1, 1]} : vector<288x4xbf16> to vector<256x4xbf16>
    %c6 = arith.constant 6 : index
    %c0_10 = arith.constant 0 : index
    %c0_11 = arith.constant 0 : index
    %27 = vector.load %arg2[%c6, %c0_10, %c0_11] : memref<9x4x4xbf16, #tpu.memory_space<vmem>>, vector<1x4x4xbf16>
    %28 = vector.shape_cast %27 : vector<1x4x4xbf16> to vector<4x4xbf16>
    %cst_12 = arith.constant dense<0.000000e+00> : vector<256x4xf32>
    %29 = tpu.matmul %26, %28, %cst_12 {dimension_numbers = #tpu.dot_dimension_numbers<[1], [0], [0], [1], [0, 0, 1, 1], [], []>} : vector<256x4xbf16>, vector<4x4xbf16>, vector<256x4xf32> -> vector<256x4xf32>
    %30 = arith.addf %25, %29 : vector<256x4xf32>
    %31 = vector.extract_strided_slice %13 {offsets = [0, 0], sizes = [256, 4], strides = [1, 1]} : vector<288x4xbf16> to vector<256x4xbf16>
    %c1 = arith.constant 1 : index
    %c0_13 = arith.constant 0 : index
    %c0_14 = arith.constant 0 : index
    %32 = vector.load %arg2[%c1, %c0_13, %c0_14] : memref<9x4x4xbf16, #tpu.memory_space<vmem>>, vector<1x4x4xbf16>
    %33 = vector.shape_cast %32 : vector<1x4x4xbf16> to vector<4x4xbf16>
    %cst_15 = arith.constant dense<0.000000e+00> : vector<256x4xf32>
    %34 = tpu.matmul %31, %33, %cst_15 {dimension_numbers = #tpu.dot_dimension_numbers<[1], [0], [0], [1], [0, 0, 1, 1], [], []>} : vector<256x4xbf16>, vector<4x4xbf16>, vector<256x4xf32> -> vector<256x4xf32>
    %35 = arith.addf %30, %34 : vector<256x4xf32>
    %36 = vector.extract_strided_slice %13 {offsets = [16, 0], sizes = [256, 4], strides = [1, 1]} : vector<288x4xbf16> to vector<256x4xbf16>
    %c4 = arith.constant 4 : index
    %c0_16 = arith.constant 0 : index
    %c0_17 = arith.constant 0 : index
    %37 = vector.load %arg2[%c4, %c0_16, %c0_17] : memref<9x4x4xbf16, #tpu.memory_space<vmem>>, vector<1x4x4xbf16>
    %38 = vector.shape_cast %37 : vector<1x4x4xbf16> to vector<4x4xbf16>
    %cst_18 = arith.constant dense<0.000000e+00> : vector<256x4xf32>
    %39 = tpu.matmul %36, %38, %cst_18 {dimension_numbers = #tpu.dot_dimension_numbers<[1], [0], [0], [1], [0, 0, 1, 1], [], []>} : vector<256x4xbf16>, vector<4x4xbf16>, vector<256x4xf32> -> vector<256x4xf32>
    %40 = arith.addf %35, %39 : vector<256x4xf32>
    %41 = vector.extract_strided_slice %13 {offsets = [32, 0], sizes = [256, 4], strides = [1, 1]} : vector<288x4xbf16> to vector<256x4xbf16>
    %c7 = arith.constant 7 : index
    %c0_19 = arith.constant 0 : index
    %c0_20 = arith.constant 0 : index
    %42 = vector.load %arg2[%c7, %c0_19, %c0_20] : memref<9x4x4xbf16, #tpu.memory_space<vmem>>, vector<1x4x4xbf16>
    %43 = vector.shape_cast %42 : vector<1x4x4xbf16> to vector<4x4xbf16>
    %cst_21 = arith.constant dense<0.000000e+00> : vector<256x4xf32>
    %44 = tpu.matmul %41, %43, %cst_21 {dimension_numbers = #tpu.dot_dimension_numbers<[1], [0], [0], [1], [0, 0, 1, 1], [], []>} : vector<256x4xbf16>, vector<4x4xbf16>, vector<256x4xf32> -> vector<256x4xf32>
    %45 = arith.addf %40, %44 : vector<256x4xf32>
    %46 = vector.extract_strided_slice %14 {offsets = [0, 0], sizes = [256, 4], strides = [1, 1]} : vector<288x4xbf16> to vector<256x4xbf16>
    %c2 = arith.constant 2 : index
    %c0_22 = arith.constant 0 : index
    %c0_23 = arith.constant 0 : index
    %47 = vector.load %arg2[%c2, %c0_22, %c0_23] : memref<9x4x4xbf16, #tpu.memory_space<vmem>>, vector<1x4x4xbf16>
    %48 = vector.shape_cast %47 : vector<1x4x4xbf16> to vector<4x4xbf16>
    %cst_24 = arith.constant dense<0.000000e+00> : vector<256x4xf32>
    %49 = tpu.matmul %46, %48, %cst_24 {dimension_numbers = #tpu.dot_dimension_numbers<[1], [0], [0], [1], [0, 0, 1, 1], [], []>} : vector<256x4xbf16>, vector<4x4xbf16>, vector<256x4xf32> -> vector<256x4xf32>
    %50 = arith.addf %45, %49 : vector<256x4xf32>
    %51 = vector.extract_strided_slice %14 {offsets = [16, 0], sizes = [256, 4], strides = [1, 1]} : vector<288x4xbf16> to vector<256x4xbf16>
    %c5 = arith.constant 5 : index
    %c0_25 = arith.constant 0 : index
    %c0_26 = arith.constant 0 : index
    %52 = vector.load %arg2[%c5, %c0_25, %c0_26] : memref<9x4x4xbf16, #tpu.memory_space<vmem>>, vector<1x4x4xbf16>
    %53 = vector.shape_cast %52 : vector<1x4x4xbf16> to vector<4x4xbf16>
    %cst_27 = arith.constant dense<0.000000e+00> : vector<256x4xf32>
    %54 = tpu.matmul %51, %53, %cst_27 {dimension_numbers = #tpu.dot_dimension_numbers<[1], [0], [0], [1], [0, 0, 1, 1], [], []>} : vector<256x4xbf16>, vector<4x4xbf16>, vector<256x4xf32> -> vector<256x4xf32>
    %55 = arith.addf %50, %54 : vector<256x4xf32>
    %56 = vector.extract_strided_slice %14 {offsets = [32, 0], sizes = [256, 4], strides = [1, 1]} : vector<288x4xbf16> to vector<256x4xbf16>
    %c8 = arith.constant 8 : index
    %c0_28 = arith.constant 0 : index
    %c0_29 = arith.constant 0 : index
    %57 = vector.load %arg2[%c8, %c0_28, %c0_29] : memref<9x4x4xbf16, #tpu.memory_space<vmem>>, vector<1x4x4xbf16>
    %58 = vector.shape_cast %57 : vector<1x4x4xbf16> to vector<4x4xbf16>
    %cst_30 = arith.constant dense<0.000000e+00> : vector<256x4xf32>
    %59 = tpu.matmul %56, %58, %cst_30 {dimension_numbers = #tpu.dot_dimension_numbers<[1], [0], [0], [1], [0, 0, 1, 1], [], []>} : vector<256x4xbf16>, vector<4x4xbf16>, vector<256x4xf32> -> vector<256x4xf32>
    %60 = arith.addf %55, %59 : vector<256x4xf32>
    %cst_31 = arith.constant dense<0.000000e+00> : vector<4xf32>
    %61 = vector.multi_reduction <add>, %60, %cst_31 [0] : vector<256x4xf32> to vector<4xf32>
    %62 = vector.shape_cast %61 : vector<4xf32> to vector<1x4xf32>
    %63 = arith.mulf %60, %60 : vector<256x4xf32>
    %cst_32 = arith.constant dense<0.000000e+00> : vector<4xf32>
    %64 = vector.multi_reduction <add>, %63, %cst_32 [0] : vector<256x4xf32> to vector<4xf32>
    %65 = vector.shape_cast %64 : vector<4xf32> to vector<1x4xf32>
    %cst_33 = arith.constant 3.906250e-03 : f32
    %66 = vector.broadcast %cst_33 : f32 to vector<1x4xf32>
    %67 = arith.mulf %62, %66 : vector<1x4xf32>
    %cst_34 = arith.constant 3.906250e-03 : f32
    %68 = vector.broadcast %cst_34 : f32 to vector<1x4xf32>
    %69 = arith.mulf %65, %68 : vector<1x4xf32>
    %70 = arith.mulf %67, %67 : vector<1x4xf32>
    %71 = arith.subf %69, %70 : vector<1x4xf32>
    %cst_35 = arith.constant 0.000000e+00 : f32
    %72 = vector.broadcast %cst_35 : f32 to vector<1x4xf32>
    %73 = arith.maximumf %71, %72 : vector<1x4xf32>
    %74 = vector.broadcast %67 : vector<1x4xf32> to vector<256x4xf32>
    %75 = arith.subf %60, %74 : vector<256x4xf32>
    %cst_36 = arith.constant 9.99999974E-6 : f32
    %76 = vector.broadcast %cst_36 : f32 to vector<1x4xf32>
    %77 = arith.addf %73, %76 : vector<1x4xf32>
    %78 = math.rsqrt %77 : vector<1x4xf32>
    %79 = vector.broadcast %78 : vector<1x4xf32> to vector<256x4xf32>
    %80 = arith.mulf %75, %79 : vector<256x4xf32>
    %cst_37 = arith.constant 0.000000e+00 : f32
    %81 = vector.broadcast %cst_37 : f32 to vector<256x4xf32>
    %82 = arith.maximumf %80, %81 : vector<256x4xf32>
    %83 = arith.truncf %82 : vector<256x4xf32> to vector<256x4xbf16>
    %84 = vector.shape_cast %83 : vector<256x4xbf16> to vector<16x16x4xbf16>
    %85 = vector.extract_strided_slice %84 {offsets = [1, 0, 0], sizes = [1, 16, 4], strides = [1, 1, 1]} : vector<16x16x4xbf16> to vector<1x16x4xbf16>
    %86 = vector.extract_strided_slice %84 {offsets = [14, 0, 0], sizes = [1, 16, 4], strides = [1, 1, 1]} : vector<16x16x4xbf16> to vector<1x16x4xbf16>
    %87 = tpu.concatenate %85, %84, %86 in 0 : vector<1x16x4xbf16>, vector<16x16x4xbf16>, vector<1x16x4xbf16> -> vector<18x16x4xbf16>
    %88 = vector.extract_strided_slice %87 {offsets = [0, 1, 0], sizes = [18, 1, 4], strides = [1, 1, 1]} : vector<18x16x4xbf16> to vector<18x1x4xbf16>
    %89 = vector.extract_strided_slice %87 {offsets = [0, 0, 0], sizes = [18, 15, 4], strides = [1, 1, 1]} : vector<18x16x4xbf16> to vector<18x15x4xbf16>
    %90 = tpu.concatenate %88, %89 in 1 : vector<18x1x4xbf16>, vector<18x15x4xbf16> -> vector<18x16x4xbf16>
    %91 = vector.extract_strided_slice %87 {offsets = [0, 1, 0], sizes = [18, 15, 4], strides = [1, 1, 1]} : vector<18x16x4xbf16> to vector<18x15x4xbf16>
    %92 = vector.extract_strided_slice %87 {offsets = [0, 14, 0], sizes = [18, 1, 4], strides = [1, 1, 1]} : vector<18x16x4xbf16> to vector<18x1x4xbf16>
    %93 = tpu.concatenate %91, %92 in 1 : vector<18x15x4xbf16>, vector<18x1x4xbf16> -> vector<18x16x4xbf16>
    %94 = vector.shape_cast %90 : vector<18x16x4xbf16> to vector<288x4xbf16>
    %95 = vector.shape_cast %87 : vector<18x16x4xbf16> to vector<288x4xbf16>
    %96 = vector.shape_cast %93 : vector<18x16x4xbf16> to vector<288x4xbf16>
    %cst_38 = arith.constant 0.000000e+00 : f32
    %97 = vector.broadcast %cst_38 : f32 to vector<256x4xf32>
    %98 = vector.extract_strided_slice %94 {offsets = [0, 0], sizes = [256, 4], strides = [1, 1]} : vector<288x4xbf16> to vector<256x4xbf16>
    %c0_39 = arith.constant 0 : index
    %c0_40 = arith.constant 0 : index
    %c0_41 = arith.constant 0 : index
    %99 = vector.load %arg3[%c0_39, %c0_40, %c0_41] : memref<9x4x4xbf16, #tpu.memory_space<vmem>>, vector<1x4x4xbf16>
    %100 = vector.shape_cast %99 : vector<1x4x4xbf16> to vector<4x4xbf16>
    %cst_42 = arith.constant dense<0.000000e+00> : vector<256x4xf32>
    %101 = tpu.matmul %98, %100, %cst_42 {dimension_numbers = #tpu.dot_dimension_numbers<[1], [0], [0], [1], [0, 0, 1, 1], [], []>} : vector<256x4xbf16>, vector<4x4xbf16>, vector<256x4xf32> -> vector<256x4xf32>
    %102 = arith.addf %97, %101 : vector<256x4xf32>
    %103 = vector.extract_strided_slice %94 {offsets = [16, 0], sizes = [256, 4], strides = [1, 1]} : vector<288x4xbf16> to vector<256x4xbf16>
    %c3_43 = arith.constant 3 : index
    %c0_44 = arith.constant 0 : index
    %c0_45 = arith.constant 0 : index
    %104 = vector.load %arg3[%c3_43, %c0_44, %c0_45] : memref<9x4x4xbf16, #tpu.memory_space<vmem>>, vector<1x4x4xbf16>
    %105 = vector.shape_cast %104 : vector<1x4x4xbf16> to vector<4x4xbf16>
    %cst_46 = arith.constant dense<0.000000e+00> : vector<256x4xf32>
    %106 = tpu.matmul %103, %105, %cst_46 {dimension_numbers = #tpu.dot_dimension_numbers<[1], [0], [0], [1], [0, 0, 1, 1], [], []>} : vector<256x4xbf16>, vector<4x4xbf16>, vector<256x4xf32> -> vector<256x4xf32>
    %107 = arith.addf %102, %106 : vector<256x4xf32>
    %108 = vector.extract_strided_slice %94 {offsets = [32, 0], sizes = [256, 4], strides = [1, 1]} : vector<288x4xbf16> to vector<256x4xbf16>
    %c6_47 = arith.constant 6 : index
    %c0_48 = arith.constant 0 : index
    %c0_49 = arith.constant 0 : index
    %109 = vector.load %arg3[%c6_47, %c0_48, %c0_49] : memref<9x4x4xbf16, #tpu.memory_space<vmem>>, vector<1x4x4xbf16>
    %110 = vector.shape_cast %109 : vector<1x4x4xbf16> to vector<4x4xbf16>
    %cst_50 = arith.constant dense<0.000000e+00> : vector<256x4xf32>
    %111 = tpu.matmul %108, %110, %cst_50 {dimension_numbers = #tpu.dot_dimension_numbers<[1], [0], [0], [1], [0, 0, 1, 1], [], []>} : vector<256x4xbf16>, vector<4x4xbf16>, vector<256x4xf32> -> vector<256x4xf32>
    %112 = arith.addf %107, %111 : vector<256x4xf32>
    %113 = vector.extract_strided_slice %95 {offsets = [0, 0], sizes = [256, 4], strides = [1, 1]} : vector<288x4xbf16> to vector<256x4xbf16>
    %c1_51 = arith.constant 1 : index
    %c0_52 = arith.constant 0 : index
    %c0_53 = arith.constant 0 : index
    %114 = vector.load %arg3[%c1_51, %c0_52, %c0_53] : memref<9x4x4xbf16, #tpu.memory_space<vmem>>, vector<1x4x4xbf16>
    %115 = vector.shape_cast %114 : vector<1x4x4xbf16> to vector<4x4xbf16>
    %cst_54 = arith.constant dense<0.000000e+00> : vector<256x4xf32>
    %116 = tpu.matmul %113, %115, %cst_54 {dimension_numbers = #tpu.dot_dimension_numbers<[1], [0], [0], [1], [0, 0, 1, 1], [], []>} : vector<256x4xbf16>, vector<4x4xbf16>, vector<256x4xf32> -> vector<256x4xf32>
    %117 = arith.addf %112, %116 : vector<256x4xf32>
    %118 = vector.extract_strided_slice %95 {offsets = [16, 0], sizes = [256, 4], strides = [1, 1]} : vector<288x4xbf16> to vector<256x4xbf16>
    %c4_55 = arith.constant 4 : index
    %c0_56 = arith.constant 0 : index
    %c0_57 = arith.constant 0 : index
    %119 = vector.load %arg3[%c4_55, %c0_56, %c0_57] : memref<9x4x4xbf16, #tpu.memory_space<vmem>>, vector<1x4x4xbf16>
    %120 = vector.shape_cast %119 : vector<1x4x4xbf16> to vector<4x4xbf16>
    %cst_58 = arith.constant dense<0.000000e+00> : vector<256x4xf32>
    %121 = tpu.matmul %118, %120, %cst_58 {dimension_numbers = #tpu.dot_dimension_numbers<[1], [0], [0], [1], [0, 0, 1, 1], [], []>} : vector<256x4xbf16>, vector<4x4xbf16>, vector<256x4xf32> -> vector<256x4xf32>
    %122 = arith.addf %117, %121 : vector<256x4xf32>
    %123 = vector.extract_strided_slice %95 {offsets = [32, 0], sizes = [256, 4], strides = [1, 1]} : vector<288x4xbf16> to vector<256x4xbf16>
    %c7_59 = arith.constant 7 : index
    %c0_60 = arith.constant 0 : index
    %c0_61 = arith.constant 0 : index
    %124 = vector.load %arg3[%c7_59, %c0_60, %c0_61] : memref<9x4x4xbf16, #tpu.memory_space<vmem>>, vector<1x4x4xbf16>
    %125 = vector.shape_cast %124 : vector<1x4x4xbf16> to vector<4x4xbf16>
    %cst_62 = arith.constant dense<0.000000e+00> : vector<256x4xf32>
    %126 = tpu.matmul %123, %125, %cst_62 {dimension_numbers = #tpu.dot_dimension_numbers<[1], [0], [0], [1], [0, 0, 1, 1], [], []>} : vector<256x4xbf16>, vector<4x4xbf16>, vector<256x4xf32> -> vector<256x4xf32>
    %127 = arith.addf %122, %126 : vector<256x4xf32>
    %128 = vector.extract_strided_slice %96 {offsets = [0, 0], sizes = [256, 4], strides = [1, 1]} : vector<288x4xbf16> to vector<256x4xbf16>
    %c2_63 = arith.constant 2 : index
    %c0_64 = arith.constant 0 : index
    %c0_65 = arith.constant 0 : index
    %129 = vector.load %arg3[%c2_63, %c0_64, %c0_65] : memref<9x4x4xbf16, #tpu.memory_space<vmem>>, vector<1x4x4xbf16>
    %130 = vector.shape_cast %129 : vector<1x4x4xbf16> to vector<4x4xbf16>
    %cst_66 = arith.constant dense<0.000000e+00> : vector<256x4xf32>
    %131 = tpu.matmul %128, %130, %cst_66 {dimension_numbers = #tpu.dot_dimension_numbers<[1], [0], [0], [1], [0, 0, 1, 1], [], []>} : vector<256x4xbf16>, vector<4x4xbf16>, vector<256x4xf32> -> vector<256x4xf32>
    %132 = arith.addf %127, %131 : vector<256x4xf32>
    %133 = vector.extract_strided_slice %96 {offsets = [16, 0], sizes = [256, 4], strides = [1, 1]} : vector<288x4xbf16> to vector<256x4xbf16>
    %c5_67 = arith.constant 5 : index
    %c0_68 = arith.constant 0 : index
    %c0_69 = arith.constant 0 : index
    %134 = vector.load %arg3[%c5_67, %c0_68, %c0_69] : memref<9x4x4xbf16, #tpu.memory_space<vmem>>, vector<1x4x4xbf16>
    %135 = vector.shape_cast %134 : vector<1x4x4xbf16> to vector<4x4xbf16>
    %cst_70 = arith.constant dense<0.000000e+00> : vector<256x4xf32>
    %136 = tpu.matmul %133, %135, %cst_70 {dimension_numbers = #tpu.dot_dimension_numbers<[1], [0], [0], [1], [0, 0, 1, 1], [], []>} : vector<256x4xbf16>, vector<4x4xbf16>, vector<256x4xf32> -> vector<256x4xf32>
    %137 = arith.addf %132, %136 : vector<256x4xf32>
    %138 = vector.extract_strided_slice %96 {offsets = [32, 0], sizes = [256, 4], strides = [1, 1]} : vector<288x4xbf16> to vector<256x4xbf16>
    %c8_71 = arith.constant 8 : index
    %c0_72 = arith.constant 0 : index
    %c0_73 = arith.constant 0 : index
    %139 = vector.load %arg3[%c8_71, %c0_72, %c0_73] : memref<9x4x4xbf16, #tpu.memory_space<vmem>>, vector<1x4x4xbf16>
    %140 = vector.shape_cast %139 : vector<1x4x4xbf16> to vector<4x4xbf16>
    %cst_74 = arith.constant dense<0.000000e+00> : vector<256x4xf32>
    %141 = tpu.matmul %138, %140, %cst_74 {dimension_numbers = #tpu.dot_dimension_numbers<[1], [0], [0], [1], [0, 0, 1, 1], [], []>} : vector<256x4xbf16>, vector<4x4xbf16>, vector<256x4xf32> -> vector<256x4xf32>
    %142 = arith.addf %137, %141 : vector<256x4xf32>
    %cst_75 = arith.constant dense<0.000000e+00> : vector<4xf32>
    %143 = vector.multi_reduction <add>, %142, %cst_75 [0] : vector<256x4xf32> to vector<4xf32>
    %144 = vector.shape_cast %143 : vector<4xf32> to vector<1x4xf32>
    %145 = arith.mulf %142, %142 : vector<256x4xf32>
    %cst_76 = arith.constant dense<0.000000e+00> : vector<4xf32>
    %146 = vector.multi_reduction <add>, %145, %cst_76 [0] : vector<256x4xf32> to vector<4xf32>
    %147 = vector.shape_cast %146 : vector<4xf32> to vector<1x4xf32>
    %cst_77 = arith.constant 3.906250e-03 : f32
    %148 = vector.broadcast %cst_77 : f32 to vector<1x4xf32>
    %149 = arith.mulf %144, %148 : vector<1x4xf32>
    %cst_78 = arith.constant 3.906250e-03 : f32
    %150 = vector.broadcast %cst_78 : f32 to vector<1x4xf32>
    %151 = arith.mulf %147, %150 : vector<1x4xf32>
    %152 = arith.mulf %149, %149 : vector<1x4xf32>
    %153 = arith.subf %151, %152 : vector<1x4xf32>
    %cst_79 = arith.constant 0.000000e+00 : f32
    %154 = vector.broadcast %cst_79 : f32 to vector<1x4xf32>
    %155 = arith.maximumf %153, %154 : vector<1x4xf32>
    %156 = vector.broadcast %149 : vector<1x4xf32> to vector<256x4xf32>
    %157 = arith.subf %142, %156 : vector<256x4xf32>
    %cst_80 = arith.constant 9.99999974E-6 : f32
    %158 = vector.broadcast %cst_80 : f32 to vector<1x4xf32>
    %159 = arith.addf %155, %158 : vector<1x4xf32>
    %160 = math.rsqrt %159 : vector<1x4xf32>
    %161 = vector.broadcast %160 : vector<1x4xf32> to vector<256x4xf32>
    %162 = arith.mulf %157, %161 : vector<256x4xf32>
    %c0_81 = arith.constant 0 : index
    %c0_82 = arith.constant 0 : index
    %c0_83 = arith.constant 0 : index
    %c0_84 = arith.constant 0 : index
    %163 = vector.load %arg1[%c0_81, %c0_82, %c0_83, %c0_84] : memref<1x16x16x4xf32, #tpu.memory_space<vmem>>, vector<1x16x16x4xf32>
    %164 = vector.shape_cast %163 : vector<1x16x16x4xf32> to vector<16x16x4xf32>
    %165 = vector.shape_cast %162 : vector<256x4xf32> to vector<16x16x4xf32>
    %166 = arith.addf %164, %165 : vector<16x16x4xf32>
    %c0_85 = arith.constant 0 : index
    %c0_86 = arith.constant 0 : index
    %c0_87 = arith.constant 0 : index
    %c0_88 = arith.constant 0 : index
    %167 = vector.load %arg4[%c0_85, %c0_86, %c0_87, %c0_88] : memref<1x16x16x4xf32, #tpu.memory_space<vmem>>, vector<1x16x16x4xf32>
    %168 = vector.shape_cast %167 : vector<1x16x16x4xf32> to vector<16x16x4xf32>
    %169 = vector.shape_cast %166 : vector<16x16x4xf32> to vector<1x16x16x4xf32>
    tpu.vector_store %arg4[%c0_85, %c0_86, %c0_87, %c0_88], %169 {strides = array<i32>} : memref<1x16x16x4xf32, #tpu.memory_space<vmem>>, vector<1x16x16x4xf32>,
    return
  }
  func.func @transform_0(%arg0: i32) -> (i32, i32, i32, i32) {
    %c0_i32 = arith.constant 0 : i32
    %c0_i32_0 = arith.constant 0 : i32
    %c0_i32_1 = arith.constant 0 : i32
    %c0_i32_2 = arith.constant 0 : i32
    return %arg0, %c0_i32, %c0_i32_0, %c0_i32_1 : i32, i32, i32, i32
  }
  func.func @transform_1(%arg0: i32) -> (i32, i32, i32) {
    %c0_i32 = arith.constant 0 : i32
    %c0_i32_0 = arith.constant 0 : i32
    %c0_i32_1 = arith.constant 0 : i32
    %c0_i32_2 = arith.constant 0 : i32
    return %c0_i32, %c0_i32_0, %c0_i32_1 : i32, i32, i32
  }
  func.func @transform_2(%arg0: i32) -> (i32, i32, i32) {
    %c0_i32 = arith.constant 0 : i32
    %c0_i32_0 = arith.constant 0 : i32
    %c0_i32_1 = arith.constant 0 : i32
    %c0_i32_2 = arith.constant 0 : i32
    return %c0_i32, %c0_i32_0, %c0_i32_1 : i32, i32, i32
  }
  func.func @transform_3(%arg0: i32) -> (i32, i32, i32, i32) {
    %c0_i32 = arith.constant 0 : i32
    %c0_i32_0 = arith.constant 0 : i32
    %c0_i32_1 = arith.constant 0 : i32
    %c0_i32_2 = arith.constant 0 : i32
    return %arg0, %c0_i32, %c0_i32_0, %c0_i32_1 : i32, i32, i32, i32
  }
}

</mosaic_0001>

<bundles_post_ra>
// kernel: tpu_custom_call.1
= control target key start
LH: loop header
LB: loop body
LE: loop exit
PB: predicated region body
PF: predicated region fallthrough
CT: control target
= control target key end

     0   :  { %s6884_s12 = smov 0   ;;  %s8911_s0 = inlined_call_operand.vmem [shape: f32[2,16,16,4], index: 0, kind: input, shape index: {}]   ;;  %s8912_s1 = inlined_call_operand.vmem [shape: bf16[9,4,4], index: 1, kind: input, shape index: {}]   ;;  %s8913_s2 = inlined_call_operand.vmem [shape: bf16[9,4,4], index: 2, kind: input, shape index: {}]   ;;  %s8914_s3 = inlined_call_operand.vmem [shape: f32[2,16,16,4], index: 3, kind: output, shape index: {}]  }
   0x1 LB: > { %s5047_s13 = sadd.s32 4294967295, %s6862_s12   ;;  %p5051_p0 = scmp.ge.s32.totalorder %s6862_s12, 1  ;;  %s6862_s12 = sphi %s6884_s12, %s13_s12  }
   0x2   : > { %p137_p1 = scmp.lt.s32.totalorder %s6862_s12, 3 }
   0x4   : > { %p138_p2 = pnand %p5051_p0, %p137_p1 }
   0x6   : > { %141 = sbr.rel (%p138_p2) target bundleno = 1733 (0x6c5), region = 32 }
   0xd   : > { %v5056_v0 = vld [vmem:[%s8912_s1 + $0x6] sm:$0x3]  ;;  %vm518_vm0 = vcmask 1041408   ;;  %p161_p3 = scmp.lt.s32.totalorder %s5047_s13, 1  ;;  %v466_v2 = vld [vmem:[%s8912_s1] sm:$0x3] }
   0xe   : > { %6794 = vmatprep.subr.msk.bf16.mxu0 %vm518_vm0, %v5056_v0  ;;  %v520_v1 = vsel %vm518_vm0, %v5056_v0, 0  ;;  %vm364_vm1 = vcmask 1040384   ;;  %vm365_vm2 = vsmask.f32 256  ;;  %vm469_vm4 = vcmask 31744  }
   0xf   : > { %5671 = vmatpush3.bf16.msra.mxu0 %v520_v1  ;;  %s8960_s13 = smov (!%p161_p3, %s5047_s13), 1  ;;  %vm6954_vm3 = vmand %vm364_vm1, %vm365_vm2  ;;  %v684_v41 = vsel %vm518_vm0, %v466_v2, 0  ;;  %v7003_v47 = vld [vmem:[%s8912_s1 + $0xc] sm:$0x3]  ;;  %vm447_vm5 = vcmask 1047552  }
  0x10   : > { %6795 = vmatprep.subr.msk.bf16.mxu0 %vm518_vm0, %v466_v2  ;;  %s5362_s18 = sshll.u32 %s8960_s13, 8  ;;  %vm448_vm6 = vsmask.f32 7424 }
  0x11   : > { %s6909_s21 = scalar_lea.vmem %s8911_s0, %s5362_s18  ;;  %vm7389_vm7 = vmand %vm447_vm5, %vm448_vm6  ;;  %s8790_s6 = scalar_lea.vmem %s8914_s3, %s5362_s18 }
  0x12   : > { %v172_v3 = vld [vmem:[%s6909_s21] sm:$0xff]  ;;  %v173_v4 = vld [vmem:[%s6909_s21 + $0x8] sm:$0xff]  ;;  %v174_v5 = vld [vmem:[%s6909_s21 + $0x10] sm:$0xff] }
  0x13   : > { %v6914_v6 = vpack.c.bf16 %v173_v4, %v172_v3  ;;  %v175_v7 = vld [vmem:[%s6909_s21 + $0x18] sm:$0xff]  ;;  %v176_v8 = vld [vmem:[%s6909_s21 + $0x20] sm:$0xff]  ;;  %v177_v9 = vld [vmem:[%s6909_s21 + $0x28] sm:$0xff] }
  0x14   : > { %v6919_v10 = vpack.c.bf16 %v175_v7, %v174_v5  ;;  %v6921_v11 = vpack.c.bf16 %v177_v9, %v176_v8  ;;  %v178_v12 = vld [vmem:[%s6909_s21 + $0x30] sm:$0xff]  ;;  %v179_v13 = vld [vmem:[%s6909_s21 + $0x38] sm:$0xff]  ;;  %v180_v17 = vld [vmem:[%s6909_s21 + $0x40] sm:$0xff] }
  0x15   : > { %v6926_v14 = vshrl.u32 %v6914_v6, 16  ;;  %v6929_v15 = vshll.u32 %v6914_v6, 16  ;;  %v6931_v16 = vpack.c.bf16 %v179_v13, %v178_v12  ;;  %v181_v18 = vld [vmem:[%s6909_s21 + $0x48] sm:$0xff]  ;;  %v182_v23 = vld [vmem:[%s6909_s21 + $0x50] sm:$0xff]  ;;  %v183_v24 = vld [vmem:[%s6909_s21 + $0x58] sm:$0xff] }
  0x16   : > { %v6936_v19 = vshrl.u32 %v6919_v10, 16  ;;  %v6939_v20 = vshll.u32 %v6919_v10, 16  ;;  %v6942_v21 = vshrl.u32 %v6921_v11, 16  ;;  %v6945_v22 = vshll.u32 %v6921_v11, 16  ;;  %v184_v31 = vld [vmem:[%s6909_s21 + $0x60] sm:$0xff]  ;;  %v185_v32 = vld [vmem:[%s6909_s21 + $0x68] sm:$0xff] }
  0x17   : > { %v288_v25 = vrot.slane %v6926_v14, 7  ;;  %v6951_v26 = vshrl.u32 %v6931_v16, 16  ;;  %v6960_v30 = vpack.c.bf16 %v181_v18, %v180_v17  ;;  %v6966_v34 = vshll.u32 %v6931_v16, 16  ;;  %v186_v52 = vld [vmem:[%s6909_s21 + $0x70] sm:$0xff]  ;;  %v187_v53 = vld [vmem:[%s6909_s21 + $0x78] sm:$0xff]  ;;  %v188_v54 = vld [vmem:[%s6909_s21 + $0x80] sm:$0xff] }
  0x18   : > { %v284_v28 = vrot.slane %v6936_v19, 7  ;;  %v292_v29 = vrot.slane %v6942_v21, 7  ;;  %v6968_v35 = vpack.c.bf16 %v183_v24, %v182_v23  ;;  %v6985_v43 = vpack.c.bf16 %v185_v32, %v184_v31  ;;  %v189_v55 = vld [vmem:[%s6909_s21 + $0x88] sm:$0xff]  ;;  %v190_v4 = vld [vmem:[%s6909_s21 + $0x90] sm:$0xff]  ;;  %v191_v5 = vld [vmem:[%s6909_s21 + $0x98] sm:$0xff] }
  0x19   : > { %v291_v33 = vor.u32 %v6929_v15, %v288_v25  ;;  %v296_v38 = vrot.slane %v6951_v26, 7  ;;  %v6974_v39 = vshrl.u32 %v6960_v30, 16  ;;  %v6983_v42 = vshll.u32 %v6960_v30, 16  ;;  %v192_v7 = vld [vmem:[%s6909_s21 + $0xa0] sm:$0xff]  ;;  %v193_v8 = vld [vmem:[%s6909_s21 + $0xa8] sm:$0xff] }
  0x1a   : > { %v287_v36 = vor.u32 %v6939_v20, %v284_v28  ;;  %v295_v37 = vor.u32 %v6945_v22, %v292_v29  ;;  %v7011_v49 = vshrl.u32 %v6968_v35, 16  ;;  %v7015_v51 = vshrl.u32 %v6985_v43, 16 }
  0x1b   : > { %v6979_v40 = vsel %vm6954_vm3, %v6926_v14, %v291_v33  ;;  %v300_v46 = vrot.slane %v6974_v39, 7  ;;  %v299_v48 = vor.u32 %v6966_v34, %v296_v38  ;;  %v7030_v58 = vshll.u32 %v6968_v35, 16  ;;  %v194_v33 = vld [vmem:[%s6909_s21 + $0xb0] sm:$0xff]  ;;  %v197_v38 = vld [vmem:[%s6909_s21 + $0xc8] sm:$0xff] }
  0x1c   : > { %5672 = vmatprep.mubr.msk.bf16.mxu0 %vm469_vm4, %v6979_v40  ;;  %v6992_v44 = vsel %vm6954_vm3, %v6936_v19, %v287_v36  ;;  %v6997_v45 = vsel %vm6954_vm3, %v6942_v21, %v295_v37  ;;  %v304_v57 = vrot.slane %v7011_v49, 7  ;;  %v7032_v59 = vpack.c.bf16 %v187_v53, %v186_v52  ;;  %v195_v36 = vld [vmem:[%s6909_s21 + $0xb8] sm:$0xff]  ;;  %v196_v37 = vld [vmem:[%s6909_s21 + $0xc0] sm:$0xff] }
  0x1d   : > { %5673 = vmatmul.mubr.msk.bf16.vlgmr.msra.gmra.mrb[0].mxu0 %vm469_vm4, %v6992_v44  ;;  %v303_v50 = vor.u32 %v6983_v42, %v300_v46  ;;  %v7026_v56 = vsel %vm6954_vm3, %v6951_v26, %v299_v48  ;;  %v308_v61 = vrot.slane %v7015_v51, 7  ;;  %v7041_v62 = vshll.u32 %v6985_v43, 16 }
  0x1e   : > { %5705 = vmatpush3.bf16.msra.mxu0 %v684_v41  ;;  %5676 = vmatprep.mubr.msk.bf16.mxu0 %vm469_vm4, %v6997_v45  ;;  %v7043_v63 = vpack.c.bf16 %v189_v55, %v188_v54  ;;  %v307_v0 = vor.u32 %v7030_v58, %v304_v57  ;;  %v7051_v1 = vshrl.u32 %v7032_v59, 16  ;;  %v7068_v13 = vshll.u32 %v7032_v59, 16 }
  0x1f   : > { %6796 = vmatprep.subr.msk.bf16.mxu0 %vm518_vm0, %v7003_v47  ;;  %v7037_v60 = vsel %vm6954_vm3, %v6974_v39, %v303_v50  ;;  %v311_v2 = vor.u32 %v7041_v62, %v308_v61  ;;  %v7070_v17 = vpack.c.bf16 %v191_v5, %v190_v4  ;;  %v7081_v25 = vpack.c.bf16 %v193_v8, %v192_v7  ;;  %v198_v4 = vld [vmem:[%s6909_s21 + $0xd0] sm:$0xff]  ;;  %v199_v5 = vld [vmem:[%s6909_s21 + $0xd8] sm:$0xff]  ;;  %v200_v7 = vld [vmem:[%s6909_s21 + $0xe0] sm:$0xff] }
  0x20   : > { %v7055_v3 = vshrl.u32 %v7043_v63, 16  ;;  %v7064_v9 = vsel %vm6954_vm3, %v7011_v49, %v307_v0  ;;  %v312_v12 = vrot.slane %v7051_v1, 7  ;;  %v7079_v24 = vshll.u32 %v7043_v63, 16  ;;  %v201_v8 = vld [vmem:[%s6909_s21 + $0xe8] sm:$0xff] }
  0x21   : > { %v7075_v18 = vsel %vm6954_vm3, %v7015_v51, %v311_v2  ;;  %v7089_v29 = vshrl.u32 %v7070_v17, 16  ;;  %v7093_v32 = vshrl.u32 %v7081_v25, 16  ;;  %v7106_v48 = vshll.u32 %v7070_v17, 16 }
  0x22   : > { %v316_v23 = vrot.slane %v7055_v3, 7  ;;  %v315_v28 = vor.u32 %v7068_v13, %v312_v12  ;;  %v7108_v50 = vpack.c.bf16 %v195_v36, %v194_v33  ;;  %v7117_v54 = vshll.u32 %v7081_v25, 16 }
  0x23   : > { %8935 = vst [vmem:[#allocation2_spill] sm:$0xff] %v7093_v32  ;;  %v320_v46 = vrot.slane %v7089_v29, 7  ;;  %v324_v53 = vrot.slane %v7093_v32, 7  ;;  %v7119_v55 = vpack.c.bf16 %v197_v38, %v196_v37  ;;  %v7157_v38 = vpack.c.bf16 %v201_v8, %v200_v7 }
  0x24   : > { %v319_v31 = vor.u32 %v7079_v24, %v316_v23  ;;  %v7102_v41 = vsel %vm6954_vm3, %v7051_v1, %v315_v28  ;;  %8936 = vst [vmem:[#allocation3_spill] sm:$0xff] %v7117_v54  ;;  %v7127_v61 = vshrl.u32 %v7108_v50, 16  ;;  %v7144_v28 = vshll.u32 %v7108_v50, 16 }
  0x25   : > { %5677 = vmatmul.mubr.msk.bf16.gmra.mrb[4].mxu0 %vm469_vm4, %v7026_v56  ;;  %v323_v57 = vor.u32 %v7106_v48, %v320_v46  ;;  %v327_v0 = vor.u32 %v7117_v54, %v324_v53  ;;  %v7131_v2 = vshrl.u32 %v7119_v55, 16  ;;  %v7155_v37 = vshll.u32 %v7119_v55, 16 }
  0x26   : > { %5680 = vmatprep.mubr.msk.bf16.mxu0 %vm469_vm4, %v7037_v60  ;;  %v7113_v52 = vsel %vm6954_vm3, %v7055_v3, %v319_v31  ;;  %8937 = vst [vmem:[#allocation4_spill] sm:$0xff] %v7127_v61  ;;  %v328_v23 = vrot.slane %v7127_v61, 7  ;;  %8939 = vst [vmem:[#allocation6_spill] sm:$0xff] %v7144_v28  ;;  %v7146_v31 = vpack.c.bf16 %v199_v5, %v198_v4  ;;  %v202_v4 = vld [vmem:[%s6909_s21 + $0xf0] sm:$0xff]  ;;  %v203_v5 = vld [vmem:[%s6909_s21 + $0xf8] sm:$0xff] }
  0x27   : > { %8938 = vst [vmem:[#allocation5_spill] sm:$0xff] %v7131_v2  ;;  %v7140_v12 = vsel %vm6954_vm3, %v7089_v29, %v323_v57  ;;  %v7151_v33 = vsel %vm6954_vm3, %v7093_v32, %v327_v0  ;;  %v332_v36 = vrot.slane %v7131_v2, 7  ;;  %8940 = vst [vmem:[#allocation7_spill] sm:$0xff] %v7155_v37  ;;  %v7169_v0 = vshrl.u32 %v7157_v38, 16 }
  0x28   : > { %v331_v46 = vor.u32 %v7144_v28, %v328_v23  ;;  %v7165_v53 = vshrl.u32 %v7146_v31, 16  ;;  %v7178_v32 = vshll.u32 %v7146_v31, 16  ;;  %v7180_v23 = vpack.c.bf16 %v203_v5, %v202_v4 }
  0x29   : > { %v335_v57 = vor.u32 %v7155_v37, %v332_v36  ;;  %v340_v37 = vrot.slane %v7169_v0, 7  ;;  %v7187_v28 = vshll.u32 %v7157_v38, 16 }
  0x2a   : > { %v378_v7 = vsel %vm6954_vm3, %v7127_v61, %v331_v46  ;;  %v336_v8 = vrot.slane %v7165_v53, 7  ;;  %v7193_v61 = vshrl.u32 %v7180_v23, 16 }
  0x2b   : > { %v379_v36 = vsel %vm6954_vm3, %v7131_v2, %v335_v57  ;;  %v343_v4 = vor.u32 %v7187_v28, %v340_v37  ;;  %v7201_v2 = vshll.u32 %v7180_v23, 16 }
  0x2c   : > { %v339_v46 = vor.u32 %v7178_v32, %v336_v8  ;;  %v344_v5 = vrot.slane %v7193_v61, 7 }
  0x2d   : > { %5681 = vmatmul.mubr.msk.bf16.gmra.mrb[8].mxu0 %vm469_vm4, %v7064_v9  ;;  %v381_v54 = vsel %vm6954_vm3, %v7169_v0, %v343_v4  ;;  %v5106_v4 = vld [vmem:[%s8912_s1 + $0x2] sm:$0x3] }
  0x2e   : > { %5684 = vmatprep.mubr.msk.bf16.mxu0 %vm469_vm4, %v7075_v18  ;;  %v380_v57 = vsel %vm6954_vm3, %v7165_v53, %v339_v46  ;;  %v347_v8 = vor.u32 %v7201_v2, %v344_v5  ;;  %v850_v46 = vsel %vm518_vm0, %v7003_v47, 0  ;;  %v5123_v47 = vld [vmem:[%s8912_s1 + $0x8] sm:$0x3] }
  0x30   : > { %v382_v37 = vsel %vm6954_vm3, %v7193_v61, %v347_v8  ;;  %v409_v8 = vrot.slane %v7178_v32, 1 }
  0x35   : > { %5685 = vmatmul.mubr.msk.bf16.gmra.mrb[12].mxu0 %vm469_vm4, %v7102_v41 }
  0x36   : > { %5688 = vmatprep.mubr.msk.bf16.mxu0 %vm469_vm4, %v7113_v52 }
  0x3d   : > { %5689 = vmatmul.mubr.msk.bf16.gmra.mrb[16].mxu0 %vm469_vm4, %v7140_v12 }
  0x3e   : > { %5692 = vmatprep.mubr.msk.bf16.mxu0 %vm469_vm4, %v7151_v33 }
  0x45   : > { %5693 = vmatmul.mubr.msk.bf16.gmra.mrb[20].mxu0 %vm469_vm4, %v378_v7 }
  0x46   : > { %5696 = vmatprep.mubr.msk.bf16.mxu0 %vm469_vm4, %v379_v36 }
  0x4d   : > { %5697 = vmatmul.mubr.msk.bf16.gmra.mrb[24].mxu0 %vm469_vm4, %v380_v57 }
  0x4e   : > { %5700 = vmatprep.mubr.msk.bf16.mxu0 %vm469_vm4, %v381_v54 }
  0x55   : > { %5701 = vmatmul.mubr.msk.bf16.gmra.mrb[28].mxu0 %vm469_vm4, %v382_v37 }
  0x56   : > { %5706 = vmatprep.mubr.msk.bf16.mxu0 %vm469_vm4, %v6992_v44 }
  0x5d   : > { %5707 = vmatmul.mubr.msk.bf16.vlgmr.msra.gmra.mrb[0].mxu0 %vm469_vm4, %v6979_v40  ;;  %v1078_v40 = vsel %vm518_vm0, %v5106_v4, 0 }
  0x5e   : > { %5739 = vmatpush3.bf16.msra.mxu0 %v850_v46  ;;  %5710 = vmatprep.mubr.msk.bf16.mxu0 %vm469_vm4, %v6992_v44 }
  0x5f   : > { %6797 = vmatprep.subr.msk.bf16.mxu0 %vm518_vm0, %v5106_v4  ;;  %v410_v4 = vor.u32 %v409_v8, %v7165_v53 }
  0x65   : > { %5711 = vmatmul.mubr.msk.bf16.gmra.mrb[4].mxu0 %vm469_vm4, %v6997_v45 }
  0x66   : > { %5714 = vmatprep.mubr.msk.bf16.mxu0 %vm469_vm4, %v7026_v56 }
  0x6d   : > { %5715 = vmatmul.mubr.msk.bf16.gmra.mrb[8].mxu0 %vm469_vm4, %v7037_v60 }
  0x6e   : > { %5718 = vmatprep.mubr.msk.bf16.mxu0 %vm469_vm4, %v7064_v9 }
  0x75   : > { %5719 = vmatmul.mubr.msk.bf16.gmra.mrb[12].mxu0 %vm469_vm4, %v7075_v18 }
  0x76   : > { %5722 = vmatprep.mubr.msk.bf16.mxu0 %vm469_vm4, %v7102_v41 }
  0x7d   : > { %5723 = vmatmul.mubr.msk.bf16.gmra.mrb[16].mxu0 %vm469_vm4, %v7113_v52 }
  0x7e   : > { %5726 = vmatprep.mubr.msk.bf16.mxu0 %vm469_vm4, %v7140_v12 }
  0x85   : > { %5727 = vmatmul.mubr.msk.bf16.gmra.mrb[20].mxu0 %vm469_vm4, %v7151_v33 }
  0x86   : > { %5730 = vmatprep.mubr.msk.bf16.mxu0 %vm469_vm4, %v378_v7 }
  0x8d   : > { %5731 = vmatmul.mubr.msk.bf16.gmra.mrb[24].mxu0 %vm469_vm4, %v379_v36 }
  0x8e   : > { %5734 = vmatprep.mubr.msk.bf16.mxu0 %vm469_vm4, %v380_v57 }
  0x95   : > { %5735 = vmatmul.mubr.msk.bf16.gmra.mrb[28].mxu0 %vm469_vm4, %v381_v54 }
  0x96   : > { %5740 = vmatprep.mubr.msk.bf16.mxu0 %vm469_vm4, %v6992_v44  ;;  %v1278_v44 = vsel %vm518_vm0, %v5123_v47, 0 }
  0x9d   : > { %5741 = vmatmul.mubr.msk.bf16.vlgmr.msra.gmra.mrb[0].mxu0 %vm469_vm4, %v6997_v45  ;;  %v5140_v45 = vld [vmem:[%s8912_s1 + $0xe] sm:$0x3] }
  0x9e   : > { %5773 = vmatpush3.bf16.msra.mxu0 %v1078_v40  ;;  %5744 = vmatprep.mubr.msk.bf16.mxu0 %vm469_vm4, %v7026_v56  ;;  %v1476_v56 = vsel %vm518_vm0, %v5140_v45, 0 }
  0x9f   : > { %6798 = vmatprep.subr.msk.bf16.mxu0 %vm518_vm0, %v5123_v47  ;;  %v411_v47 = vrot.slane %v7187_v28, 1 }
  0xa5   : > { %5745 = vmatmul.mubr.msk.bf16.gmra.mrb[4].mxu0 %vm469_vm4, %v7037_v60  ;;  %v5157_v60 = vld [vmem:[%s8912_s1 + $0x4] sm:$0x3] }
  0xa6   : > { %5748 = vmatprep.mubr.msk.bf16.mxu0 %vm469_vm4, %v7064_v9  ;;  %v5174_v9 = vld [vmem:[%s8912_s1 + $0xa] sm:$0x3] }
  0xad   : > { %5749 = vmatmul.mubr.msk.bf16.gmra.mrb[8].mxu0 %vm469_vm4, %v7075_v18 }
  0xae   : > { %5752 = vmatprep.mubr.msk.bf16.mxu0 %vm469_vm4, %v7102_v41 }
  0xb5   : > { %5753 = vmatmul.mubr.msk.bf16.gmra.mrb[12].mxu0 %vm469_vm4, %v7113_v52 }
  0xb6   : > { %5756 = vmatprep.mubr.msk.bf16.mxu0 %vm469_vm4, %v7140_v12  ;;  %v401_v12 = vrot.slane %v7106_v48, 1 }
  0xbd   : > { %5757 = vmatmul.mubr.msk.bf16.gmra.mrb[16].mxu0 %vm469_vm4, %v7151_v33 }
  0xbe   : > { %5760 = vmatprep.mubr.msk.bf16.mxu0 %vm469_vm4, %v378_v7 }
  0xc5   : > { %5761 = vmatmul.mubr.msk.bf16.gmra.mrb[20].mxu0 %vm469_vm4, %v379_v36  ;;  %v8946_v36 = vld [vmem:[#allocation4_spill] sm:$0xff] }
  0xc6   : > { %5764 = vmatprep.mubr.msk.bf16.mxu0 %vm469_vm4, %v380_v57  ;;  %v8947_v57 = vld [vmem:[#allocation7_spill] sm:$0xff] }
  0xc7   : > { %v407_v5 = vrot.slane %v8947_v57, 1 }
  0xcd   : > { %5765 = vmatmul.mubr.msk.bf16.gmra.mrb[24].mxu0 %vm469_vm4, %v381_v54 }
  0xce   : > { %5768 = vmatprep.mubr.msk.bf16.mxu0 %vm469_vm4, %v382_v37  ;;  %v8948_v37 = vld [vmem:[#allocation5_spill] sm:$0xff] }
  0xcf   : > { %v408_v46 = vor.u32 %v407_v5, %v8948_v37 }
  0xd1   : > { %v462_v40 = vsel %vm7389_vm7, %v408_v46, %v8947_v57 }
  0xd5   : > { %5769 = vmatmul.mubr.msk.bf16.gmra.mrb[28].mxu0 %vm469_vm4, %v381_v54  ;;  %v397_v54 = vrot.slane %v7068_v13, 1 }
  0xd6   : > { %5774 = vmatprep.mubr.msk.bf16.mxu0 %vm469_vm4, %v6919_v10 }
  0xdd   : > { %5775 = vmatmul.mubr.msk.bf16.vlgmr.msra.gmra.mrb[0].mxu0 %vm469_vm4, %v6914_v6 }
  0xde   : > { %5807 = vmatpush3.bf16.msra.mxu0 %v1278_v44  ;;  %5778 = vmatprep.mubr.msk.bf16.mxu0 %vm469_vm4, %v6919_v10  ;;  %v463_v44 = vsel %vm7389_vm7, %v410_v4, %v7178_v32  ;;  %v413_v32 = vrot.slane %v7201_v2, 1 }
  0xdf   : > { %6799 = vmatprep.subr.msk.bf16.mxu0 %vm518_vm0, %v5140_v45  ;;  %v412_v45 = vor.u32 %v411_v47, %v7169_v0 }
  0xe1   : > { %v464_v53 = vsel %vm7389_vm7, %v412_v45, %v7187_v28  ;;  %v414_v28 = vor.u32 %v413_v32, %v7193_v61  ;;  %v5208_v61 = vld [vmem:[%s8913_s2 + $0x6] sm:$0x3] }
  0xe2   : > { %6803 = vmatprep.subr.msk.bf16.mxu1 %vm518_vm0, %v5208_v61 }
  0xe3   : > { %v465_v0 = vsel %vm7389_vm7, %v414_v28, %v7201_v2  ;;  %v2894_v2 = vsel %vm518_vm0, %v5208_v61, 0 }
  0xe4   : > { %5977 = vmatpush3.bf16.msra.mxu1 %v2894_v2 }
  0xe5   : > { %5779 = vmatmul.mubr.msk.bf16.gmra.mrb[4].mxu0 %vm469_vm4, %v6921_v11 }
  0xe6   : > { %5782 = vmatprep.mubr.msk.bf16.mxu0 %vm469_vm4, %v6931_v16 }
  0xed   : > { %5783 = vmatmul.mubr.msk.bf16.gmra.mrb[8].mxu0 %vm469_vm4, %v6960_v30 }
  0xee   : > { %5786 = vmatprep.mubr.msk.bf16.mxu0 %vm469_vm4, %v6968_v35 }
  0xf5   : > { %5787 = vmatmul.mubr.msk.bf16.gmra.mrb[12].mxu0 %vm469_vm4, %v6985_v43 }
  0xf6   : > { %5790 = vmatprep.mubr.msk.bf16.mxu0 %vm469_vm4, %v7032_v59 }
  0xfd   : > { %5791 = vmatmul.mubr.msk.bf16.gmra.mrb[16].mxu0 %vm469_vm4, %v7043_v63 }
  0xfe   : > { %5794 = vmatprep.mubr.msk.bf16.mxu0 %vm469_vm4, %v7070_v17 }
 0x105   : > { %5795 = vmatmul.mubr.msk.bf16.gmra.mrb[20].mxu0 %vm469_vm4, %v7081_v25 }
 0x106   : > { %5798 = vmatprep.mubr.msk.bf16.mxu0 %vm469_vm4, %v7108_v50 }
 0x10d   : > { %5799 = vmatmul.mubr.msk.bf16.gmra.mrb[24].mxu0 %vm469_vm4, %v7119_v55 }
 0x10e   : > { %5802 = vmatprep.mubr.msk.bf16.mxu0 %vm469_vm4, %v7146_v31 }
 0x115   : > { %5803 = vmatmul.mubr.msk.bf16.gmra.mrb[28].mxu0 %vm469_vm4, %v7157_v38 }
 0x116   : > { %5808 = vmatprep.mubr.msk.bf16.mxu0 %vm469_vm4, %v6914_v6  ;;  %v1719_v6 = vsel %vm518_vm0, %v5157_v60, 0 }
 0x11d   : > { %5809 = vmatmul.mubr.msk.bf16.vlgmr.msra.gmra.mrb[0].mxu0 %vm469_vm4, %v6919_v10 }
 0x11e   : > { %5841 = vmatpush3.bf16.msra.mxu0 %v1476_v56  ;;  %5812 = vmatprep.mubr.msk.bf16.mxu0 %vm469_vm4, %v6921_v11 }
 0x11f   : > { %6800 = vmatprep.subr.msk.bf16.mxu0 %vm518_vm0, %v5157_v60  ;;  %v7561_v60 = vld [vmem:[%s8913_s2] sm:$0x3] }
 0x120   : > { %6804 = vmatprep.subr.msk.bf16.mxu1 %vm518_vm0, %v7561_v60 }
 0x125   : > { %5813 = vmatmul.mubr.msk.bf16.gmra.mrb[4].mxu0 %vm469_vm4, %v6931_v16 }
 0x126   : > { %5816 = vmatprep.mubr.msk.bf16.mxu0 %vm469_vm4, %v6960_v30 }
 0x12d   : > { %5817 = vmatmul.mubr.msk.bf16.gmra.mrb[8].mxu0 %vm469_vm4, %v6968_v35 }
 0x12e   : > { %5820 = vmatprep.mubr.msk.bf16.mxu0 %vm469_vm4, %v6985_v43 }
 0x135   : > { %5821 = vmatmul.mubr.msk.bf16.gmra.mrb[12].mxu0 %vm469_vm4, %v7032_v59 }
 0x136   : > { %5824 = vmatprep.mubr.msk.bf16.mxu0 %vm469_vm4, %v7043_v63 }
 0x13d   : > { %5825 = vmatmul.mubr.msk.bf16.gmra.mrb[16].mxu0 %vm469_vm4, %v7070_v17 }
 0x13e   : > { %5828 = vmatprep.mubr.msk.bf16.mxu0 %vm469_vm4, %v7081_v25 }
 0x145   : > { %5829 = vmatmul.mubr.msk.bf16.gmra.mrb[20].mxu0 %vm469_vm4, %v7108_v50 }
 0x146   : > { %5832 = vmatprep.mubr.msk.bf16.mxu0 %vm469_vm4, %v7119_v55 }
 0x14d   : > { %5833 = vmatmul.mubr.msk.bf16.gmra.mrb[24].mxu0 %vm469_vm4, %v7146_v31 }
 0x14e   : > { %5836 = vmatprep.mubr.msk.bf16.mxu0 %vm469_vm4, %v7157_v38 }
 0x155   : > { %5837 = vmatmul.mubr.msk.bf16.gmra.mrb[28].mxu0 %vm469_vm4, %v7180_v23 }
 0x156   : > { %5842 = vmatprep.mubr.msk.bf16.mxu0 %vm469_vm4, %v6919_v10  ;;  %v383_v10 = vrot.slane %v6939_v20, 1 }
 0x15d   : > { %5843 = vmatmul.mubr.msk.bf16.vlgmr.msra.gmra.mrb[0].mxu0 %vm469_vm4, %v6921_v11  ;;  %v384_v11 = vor.u32 %v383_v10, %v6936_v19 }
 0x15e   : > { %5875 = vmatpush3.bf16.msra.mxu0 %v1719_v6  ;;  %5846 = vmatprep.mubr.msk.bf16.mxu0 %vm469_vm4, %v6931_v16 }
 0x15f   : > { %6801 = vmatprep.subr.msk.bf16.mxu0 %vm518_vm0, %v5174_v9 }
 0x165   : > { %5847 = vmatmul.mubr.msk.bf16.gmra.mrb[4].mxu0 %vm469_vm4, %v6960_v30  ;;  %v385_v30 = vrot.slane %v6929_v15, 1 }
 0x166   : > { %5850 = vmatprep.mubr.msk.bf16.mxu0 %vm469_vm4, %v6968_v35  ;;  %v7397_v35 = vsel %vm7389_vm7, %v384_v11, %v6939_v20  ;;  %v5191_v20 = vld [vmem:[%s8912_s1 + $0x10] sm:$0x3] }
 0x167   : > { %v2118_v56 = vsel %vm518_vm0, %v5191_v20, 0 }
 0x16d   : > { %5851 = vmatmul.mubr.msk.bf16.gmra.mrb[8].mxu0 %vm469_vm4, %v6985_v43  ;;  %v386_v43 = vor.u32 %v385_v30, %v6926_v14 }
 0x16e   : > { %5854 = vmatprep.mubr.msk.bf16.mxu0 %vm469_vm4, %v7032_v59  ;;  %v387_v59 = vrot.slane %v6945_v22, 1 }
 0x16f   : > { %v451_v19 = vsel %vm7389_vm7, %v386_v43, %v6929_v15 }
 0x170   : > { %v388_v14 = vor.u32 %v387_v59, %v6942_v21 }
 0x172   : > { %v7422_v18 = vsel %vm7389_vm7, %v388_v14, %v6945_v22 }
 0x175   : > { %5855 = vmatmul.mubr.msk.bf16.gmra.mrb[12].mxu0 %vm469_vm4, %v7043_v63  ;;  %v1920_v63 = vsel %vm518_vm0, %v5174_v9, 0 }
 0x176   : > { %5858 = vmatprep.mubr.msk.bf16.mxu0 %vm469_vm4, %v7070_v17  ;;  %v389_v17 = vrot.slane %v6966_v34, 1 }
 0x178   : > { %v390_v15 = vor.u32 %v389_v17, %v6951_v26 }
 0x17a   : > { %v7428_v41 = vsel %vm7389_vm7, %v390_v15, %v6966_v34  ;;  %v395_v34 = vrot.slane %v7041_v62, 1 }
 0x17d   : > { %5859 = vmatmul.mubr.msk.bf16.gmra.mrb[16].mxu0 %vm469_vm4, %v7081_v25  ;;  %v391_v25 = vrot.slane %v6983_v42, 1 }
 0x17e   : > { %5862 = vmatprep.mubr.msk.bf16.mxu0 %vm469_vm4, %v7108_v50  ;;  %v393_v50 = vrot.slane %v7030_v58, 1 }
 0x17f   : > { %v392_v21 = vor.u32 %v391_v25, %v6974_v39  ;;  %v396_v39 = vor.u32 %v395_v34, %v7015_v51 }
 0x180   : > { %v394_v22 = vor.u32 %v393_v50, %v7011_v49 }
 0x181   : > { %v7440_v26 = vsel %vm7389_vm7, %v392_v21, %v6983_v42  ;;  %v398_v42 = vor.u32 %v397_v54, %v7051_v1  ;;  %v456_v49 = vsel %vm7389_vm7, %v396_v39, %v7041_v62  ;;  %v402_v1 = vor.u32 %v401_v12, %v7089_v29 }
 0x182   : > { %v7446_v52 = vsel %vm7389_vm7, %v394_v22, %v7030_v58 }
 0x183   : > { %v457_v58 = vsel %vm7389_vm7, %v398_v42, %v7068_v13  ;;  %v459_v13 = vsel %vm7389_vm7, %v402_v1, %v7106_v48 }
 0x185   : > { %5863 = vmatmul.mubr.msk.bf16.gmra.mrb[20].mxu0 %vm469_vm4, %v7119_v55  ;;  %v399_v55 = vrot.slane %v7079_v24, 1 }
 0x186   : > { %5866 = vmatprep.mubr.msk.bf16.mxu0 %vm469_vm4, %v7146_v31  ;;  %v8943_v31 = vld [vmem:[#allocation3_spill] sm:$0xff] }
 0x187   : > { %v400_v51 = vor.u32 %v399_v55, %v7055_v3  ;;  %v403_v33 = vrot.slane %v8943_v31, 1 }
 0x189   : > { %v458_v62 = vsel %vm7389_vm7, %v400_v51, %v7079_v24 }
 0x18d   : > { %5867 = vmatmul.mubr.msk.bf16.gmra.mrb[24].mxu0 %vm469_vm4, %v7157_v38 }
 0x18e   : > { %5870 = vmatprep.mubr.msk.bf16.mxu0 %vm469_vm4, %v7180_v23  ;;  %v8945_v23 = vld [vmem:[#allocation2_spill] sm:$0xff] }
 0x18f   : > { %v404_v3 = vor.u32 %v403_v33, %v8945_v23 }
 0x191   : > { %v460_v24 = vsel %vm7389_vm7, %v404_v3, %v8943_v31 }
 0x195   : > { %5871 = vmatmul.mubr.msk.bf16.gmra.mrb[28].mxu0 %vm469_vm4, %v7157_v38  ;;  %v8944_v38 = vld [vmem:[#allocation6_spill] sm:$0xff] }
 0x196   : > { %5876 = vmatprep.mubr.msk.bf16.mxu0 %vm469_vm4, %v7397_v35  ;;  %v405_v7 = vrot.slane %v8944_v38, 1 }
 0x198   : > { %v406_v29 = vor.u32 %v405_v7, %v8946_v36 }
 0x19a   : > { %v461_v48 = vsel %vm7389_vm7, %v406_v29, %v8944_v38 }
 0x19d   : > { %5877 = vmatmul.mubr.msk.bf16.vlgmr.msra.gmra.mrb[0].mxu0 %vm469_vm4, %v451_v19 }
 0x19e   : > { %5909 = vmatpush3.bf16.msra.mxu0 %v1920_v63  ;;  %5880 = vmatprep.mubr.msk.bf16.mxu0 %vm469_vm4, %v7397_v35 }
 0x19f   : > { %6802 = vmatprep.subr.msk.bf16.mxu0 %vm518_vm0, %v5191_v20 }
 0x1a5   : > { %5881 = vmatmul.mubr.msk.bf16.gmra.mrb[4].mxu0 %vm469_vm4, %v7422_v18 }
 0x1a6   : > { %5884 = vmatprep.mubr.msk.bf16.mxu0 %vm469_vm4, %v7428_v41 }
 0x1ad   : > { %5885 = vmatmul.mubr.msk.bf16.gmra.mrb[8].mxu0 %vm469_vm4, %v7440_v26 }
 0x1ae   : > { %5888 = vmatprep.mubr.msk.bf16.mxu0 %vm469_vm4, %v7446_v52 }
 0x1b5   : > { %5889 = vmatmul.mubr.msk.bf16.gmra.mrb[12].mxu0 %vm469_vm4, %v456_v49 }
 0x1b6   : > { %5892 = vmatprep.mubr.msk.bf16.mxu0 %vm469_vm4, %v457_v58 }
 0x1bd   : > { %5893 = vmatmul.mubr.msk.bf16.gmra.mrb[16].mxu0 %vm469_vm4, %v458_v62 }
 0x1be   : > { %5896 = vmatprep.mubr.msk.bf16.mxu0 %vm469_vm4, %v459_v13 }
 0x1c5   : > { %5897 = vmatmul.mubr.msk.bf16.gmra.mrb[20].mxu0 %vm469_vm4, %v460_v24 }
 0x1c6   : > { %5900 = vmatprep.mubr.msk.bf16.mxu0 %vm469_vm4, %v461_v48 }
 0x1cd   : > { %5901 = vmatmul.mubr.msk.bf16.gmra.mrb[24].mxu0 %vm469_vm4, %v462_v40 }
 0x1ce   : > { %5904 = vmatprep.mubr.msk.bf16.mxu0 %vm469_vm4, %v463_v44 }
 0x1d5   : > { %5905 = vmatmul.mubr.msk.bf16.gmra.mrb[28].mxu0 %vm469_vm4, %v464_v53 }
 0x1d6   : > { %5910 = vmatprep.mubr.msk.bf16.mxu0 %vm469_vm4, %v451_v19 }
 0x1dd   : > { %5911 = vmatmul.mubr.msk.bf16.vlgmr.msra.gmra.mrb[0].mxu0 %vm469_vm4, %v7397_v35 }
 0x1de   : > { %5943 = vmatpush3.bf16.msra.mxu0 %v2118_v56  ;;  %5914 = vmatprep.mubr.msk.bf16.mxu0 %vm469_vm4, %v7422_v18 }
 0x1e5   : > { %5915 = vmatmul.mubr.msk.bf16.gmra.mrb[4].mxu0 %vm469_vm4, %v7428_v41 }
 0x1e6   : > { %5918 = vmatprep.mubr.msk.bf16.mxu0 %vm469_vm4, %v7440_v26 }
 0x1ed   : > { %5919 = vmatmul.mubr.msk.bf16.gmra.mrb[8].mxu0 %vm469_vm4, %v7446_v52 }
 0x1ee   : > { %5922 = vmatprep.mubr.msk.bf16.mxu0 %vm469_vm4, %v456_v49 }
 0x1f5   : > { %5923 = vmatmul.mubr.msk.bf16.gmra.mrb[12].mxu0 %vm469_vm4, %v457_v58 }
 0x1f6   : > { %5926 = vmatprep.mubr.msk.bf16.mxu0 %vm469_vm4, %v458_v62 }
 0x1fd   : > { %5927 = vmatmul.mubr.msk.bf16.gmra.mrb[16].mxu0 %vm469_vm4, %v459_v13 }
 0x1fe   : > { %5930 = vmatprep.mubr.msk.bf16.mxu0 %vm469_vm4, %v460_v24 }
 0x205   : > { %5931 = vmatmul.mubr.msk.bf16.gmra.mrb[20].mxu0 %vm469_vm4, %v461_v48 }
 0x206   : > { %5934 = vmatprep.mubr.msk.bf16.mxu0 %vm469_vm4, %v462_v40 }
 0x20d   : > { %5935 = vmatmul.mubr.msk.bf16.gmra.mrb[24].mxu0 %vm469_vm4, %v463_v44 }
 0x20e   : > { %5938 = vmatprep.mubr.msk.bf16.mxu0 %vm469_vm4, %v464_v53 }
 0x215   : > { %5939 = vmatmul.mubr.msk.bf16.gmra.mrb[28].mxu0 %vm469_vm4, %v465_v0 }
 0x216   : > { %5944 = vmatprep.mubr.msk.bf16.mxu0 %vm469_vm4, %v7397_v35 }
 0x21d   : > { %5945 = vmatmul.mubr.msk.bf16.vlgmr.msra.gmra.mrb[0].mxu0 %vm469_vm4, %v7422_v18 }
 0x21e   : > { %5948 = vmatprep.mubr.msk.bf16.mxu0 %vm469_vm4, %v7428_v41 }
 0x225   : > { %5949 = vmatmul.mubr.msk.bf16.gmra.mrb[4].mxu0 %vm469_vm4, %v7440_v26 }
 0x226   : > { %5952 = vmatprep.mubr.msk.bf16.mxu0 %vm469_vm4, %v7446_v52 }
 0x22d   : > { %5953 = vmatmul.mubr.msk.bf16.gmra.mrb[8].mxu0 %vm469_vm4, %v456_v49 }
 0x22e   : > { %5956 = vmatprep.mubr.msk.bf16.mxu0 %vm469_vm4, %v457_v58 }
 0x235   : > { %5957 = vmatmul.mubr.msk.bf16.gmra.mrb[12].mxu0 %vm469_vm4, %v458_v62 }
 0x236   : > { %5960 = vmatprep.mubr.msk.bf16.mxu0 %vm469_vm4, %v459_v13 }
 0x23d   : > { %5961 = vmatmul.mubr.msk.bf16.gmra.mrb[16].mxu0 %vm469_vm4, %v460_v24 }
 0x23e   : > { %5964 = vmatprep.mubr.msk.bf16.mxu0 %vm469_vm4, %v461_v48 }
 0x245   : > { %5965 = vmatmul.mubr.msk.bf16.gmra.mrb[20].mxu0 %vm469_vm4, %v462_v40 }
 0x246   : > { %5968 = vmatprep.mubr.msk.bf16.mxu0 %vm469_vm4, %v463_v44 }
 0x24d   : > { %5969 = vmatmul.mubr.msk.bf16.gmra.mrb[24].mxu0 %vm469_vm4, %v464_v53 }
 0x24e   : > { %5972 = vmatprep.mubr.msk.bf16.mxu0 %vm469_vm4, %v465_v0 }
 0x255   : > { %5973 = vmatmul.mubr.msk.bf16.gmra.mrb[28].mxu0 %vm469_vm4, %v464_v53 }
 0x2f0   : > { %v7563_v6 = vpop.f32.mrb[0].mxu0 }
 0x2f1   : > { %v7567_v9 = vpop.f32.mrb[1].mxu0  ;;  %v2384_v35 = vmul.f32 %v7563_v6, %v7563_v6  ;;  %v2316_v17 = vsel %vm469_vm4, %v7563_v6, 0.0 }
 0x2f2   : > { %v2382_v10 = vmul.f32 %v7567_v9, %v7567_v9  ;;  %v7571_v11 = vpop.f32.mrb[2].mxu0  ;;  %v2313_v43 = vsel %vm469_vm4, %v7567_v9, 0.0 }
 0x2f3   : > { %v7573_v30 = vpop.f32.mrb[3].mxu0  ;;  %v2385_v14 = vmul.f32 %v7571_v11, %v7571_v11  ;;  %v2417_v41 = vsel %vm469_vm4, %v2384_v35, 0.0  ;;  %v2318_v50 = vsel %vm469_vm4, %v7571_v11, 0.0 }
 0x2f4   : > { %v2314_v19 = vsel %vm469_vm4, %v7573_v30, 0.0  ;;  %v2383_v59 = vmul.f32 %v7573_v30, %v7573_v30  ;;  %v2414_v20 = vsel %vm469_vm4, %v2382_v10, 0.0 }
 0x2f5   : > { %v2315_v63 = vadd.f32 %v2314_v19, %v2313_v43  ;;  %v2419_v52 = vsel %vm469_vm4, %v2385_v14, 0.0 }
 0x2f6   : > { %v2415_v15 = vsel %vm469_vm4, %v2383_v59, 0.0 }
 0x2f7   : > { %v2317_v18 = vadd.f32 %v2316_v17, %v2315_v63  ;;  %v2416_v25 = vadd.f32 %v2415_v15, %v2414_v20 }
 0x2f8   : > { %v7592_v21 = vpop.f32.mrb[4].mxu0 }
 0x2f9   : > { %v2418_v22 = vadd.f32 %v2417_v41, %v2416_v25  ;;  %v7594_v26 = vpop.f32.mrb[5].mxu0  ;;  %v2319_v34 = vadd.f32 %v2318_v50, %v2317_v18  ;;  %v2388_v12 = vmul.f32 %v7592_v21, %v7592_v21  ;;  %v2324_v13 = vsel %vm469_vm4, %v7592_v21, 0.0 }
 0x2fa   : > { %v2320_v54 = vsel %vm469_vm4, %v7594_v26, 0.0  ;;  %v2386_v39 = vmul.f32 %v7594_v26, %v7594_v26  ;;  %v7601_v42 = vpop.f32.mrb[6].mxu0 }
 0x2fb   : > { %v2321_v49 = vadd.f32 %v2320_v54, %v2319_v34  ;;  %v2420_v55 = vadd.f32 %v2419_v52, %v2418_v22  ;;  %v7603_v58 = vpop.f32.mrb[7].mxu0  ;;  %v2389_v38 = vmul.f32 %v7601_v42, %v7601_v42  ;;  %v2425_v36 = vsel %vm469_vm4, %v2388_v12, 0.0 }
 0x2fc   : > { %v2421_v51 = vsel %vm469_vm4, %v2386_v39, 0.0  ;;  %v2322_v1 = vsel %vm469_vm4, %v7603_v58, 0.0  ;;  %v2387_v62 = vmul.f32 %v7603_v58, %v7603_v58  ;;  %v2326_v29 = vsel %vm469_vm4, %v7601_v42, 0.0 }
 0x2fd   : > { %v2422_v31 = vadd.f32 %v2421_v51, %v2420_v55  ;;  %v2323_v33 = vadd.f32 %v2322_v1, %v2321_v49  ;;  %v2427_v8 = vsel %vm469_vm4, %v2389_v38, 0.0 }
 0x2fe   : > { %v2423_v7 = vsel %vm469_vm4, %v2387_v62, 0.0 }
 0x2ff   : > { %v2325_v23 = vadd.f32 %v2324_v13, %v2323_v33  ;;  %v2424_v3 = vadd.f32 %v2423_v7, %v2422_v31 }
 0x300   : > { %v7620_v24 = vpop.f32.mrb[8].mxu0 }
 0x301   : > { %v2426_v57 = vadd.f32 %v2425_v36, %v2424_v3  ;;  %v7622_v5 = vpop.f32.mrb[9].mxu0  ;;  %v2327_v48 = vadd.f32 %v2326_v29, %v2325_v23  ;;  %v2392_v45 = vmul.f32 %v7620_v24, %v7620_v24  ;;  %v2332_v61 = vsel %vm469_vm4, %v7620_v24, 0.0 }
 0x302   : > { %v2328_v37 = vsel %vm469_vm4, %v7622_v5, 0.0  ;;  %v2390_v46 = vmul.f32 %v7622_v5, %v7622_v5  ;;  %v7629_v4 = vpop.f32.mrb[10].mxu0 }
 0x303   : > { %v2329_v40 = vadd.f32 %v2328_v37, %v2327_v48  ;;  %v2428_v47 = vadd.f32 %v2427_v8, %v2426_v57  ;;  %v7631_v44 = vpop.f32.mrb[11].mxu0  ;;  %v2393_v2 = vmul.f32 %v7629_v4, %v7629_v4  ;;  %v2433_v19 = vsel %vm469_vm4, %v2392_v45, 0.0 }
 0x304   : > { %v2429_v53 = vsel %vm469_vm4, %v2390_v46, 0.0  ;;  %v2330_v56 = vsel %vm469_vm4, %v7631_v44, 0.0  ;;  %v2391_v32 = vmul.f32 %v7631_v44, %v7631_v44  ;;  %v2334_v59 = vsel %vm469_vm4, %v7629_v4, 0.0 }
 0x305   : > { %v2430_v28 = vadd.f32 %v2429_v53, %v2428_v47  ;;  %v2331_v0 = vadd.f32 %v2330_v56, %v2329_v40  ;;  %v2435_v15 = vsel %vm469_vm4, %v2393_v2, 0.0 }
 0x306   : > { %v2431_v10 = vsel %vm469_vm4, %v2391_v32, 0.0 }
 0x307   : > { %v2333_v35 = vadd.f32 %v2332_v61, %v2331_v0  ;;  %v2432_v43 = vadd.f32 %v2431_v10, %v2430_v28 }
 0x308   : > { %v7648_v63 = vpop.f32.mrb[12].mxu0 }
 0x309   : > { %v2434_v17 = vadd.f32 %v2433_v19, %v2432_v43  ;;  %v7650_v20 = vpop.f32.mrb[13].mxu0  ;;  %v2335_v14 = vadd.f32 %v2334_v59, %v2333_v35  ;;  %v2396_v52 = vmul.f32 %v7648_v63, %v7648_v63  ;;  %v2340_v51 = vsel %vm469_vm4, %v7648_v63, 0.0 }
 0x30a   : > { %v2336_v18 = vsel %vm469_vm4, %v7650_v20, 0.0  ;;  %v2394_v25 = vmul.f32 %v7650_v20, %v7650_v20  ;;  %v7657_v41 = vpop.f32.mrb[14].mxu0 }
 0x30b   : > { %v2337_v50 = vadd.f32 %v2336_v18, %v2335_v14  ;;  %v2436_v22 = vadd.f32 %v2435_v15, %v2434_v17  ;;  %v7659_v34 = vpop.f32.mrb[15].mxu0  ;;  %v2397_v1 = vmul.f32 %v7657_v41, %v7657_v41  ;;  %v2441_v13 = vsel %vm469_vm4, %v2396_v52, 0.0 }
 0x30c   : > { %v2437_v54 = vsel %vm469_vm4, %v2394_v25, 0.0  ;;  %v2338_v39 = vsel %vm469_vm4, %v7659_v34, 0.0  ;;  %v2395_v49 = vmul.f32 %v7659_v34, %v7659_v34  ;;  %v2342_v38 = vsel %vm469_vm4, %v7657_v41, 0.0 }
 0x30d   : > { %v2438_v55 = vadd.f32 %v2437_v54, %v2436_v22  ;;  %v2339_v12 = vadd.f32 %v2338_v39, %v2337_v50  ;;  %v2443_v29 = vsel %vm469_vm4, %v2397_v1, 0.0 }
 0x30e   : > { %v2439_v62 = vsel %vm469_vm4, %v2395_v49, 0.0 }
 0x30f   : > { %v2341_v31 = vadd.f32 %v2340_v51, %v2339_v12  ;;  %v2440_v33 = vadd.f32 %v2439_v62, %v2438_v55 }
 0x310   : > { %v7676_v7 = vpop.f32.mrb[16].mxu0 }
 0x311   : > { %v2442_v23 = vadd.f32 %v2441_v13, %v2440_v33  ;;  %v7678_v3 = vpop.f32.mrb[17].mxu0  ;;  %v2343_v36 = vadd.f32 %v2342_v38, %v2341_v31  ;;  %v2400_v47 = vmul.f32 %v7676_v7, %v7676_v7  ;;  %v2348_v0 = vsel %vm469_vm4, %v7676_v7, 0.0 }
 0x312   : > { %v2344_v57 = vsel %vm469_vm4, %v7678_v3, 0.0  ;;  %v2398_v48 = vmul.f32 %v7678_v3, %v7678_v3  ;;  %v7685_v8 = vpop.f32.mrb[18].mxu0 }
 0x313   : > { %v2345_v37 = vadd.f32 %v2344_v57, %v2343_v36  ;;  %v2444_v46 = vadd.f32 %v2443_v29, %v2442_v23  ;;  %v7687_v40 = vpop.f32.mrb[19].mxu0  ;;  %v2401_v61 = vmul.f32 %v7685_v8, %v7685_v8  ;;  %v2449_v43 = vsel %vm469_vm4, %v2400_v47, 0.0 }
 0x314   : > { %v2445_v45 = vsel %vm469_vm4, %v2398_v48, 0.0  ;;  %v2346_v53 = vsel %vm469_vm4, %v7687_v40, 0.0  ;;  %v2399_v56 = vmul.f32 %v7687_v40, %v7687_v40  ;;  %v2350_v19 = vsel %vm469_vm4, %v7685_v8, 0.0 }
 0x315   : > { %v2446_v32 = vadd.f32 %v2445_v45, %v2444_v46  ;;  %v2347_v28 = vadd.f32 %v2346_v53, %v2345_v37  ;;  %v2451_v18 = vsel %vm469_vm4, %v2401_v61, 0.0 }
 0x316   : > { %v2447_v2 = vsel %vm469_vm4, %v2399_v56, 0.0 }
 0x317   : > { %v2349_v10 = vadd.f32 %v2348_v0, %v2347_v28  ;;  %v2448_v35 = vadd.f32 %v2447_v2, %v2446_v32 }
 0x318   : > { %v7704_v59 = vpop.f32.mrb[20].mxu0 }
 0x319   : > { %v2450_v17 = vadd.f32 %v2449_v43, %v2448_v35  ;;  %v7706_v14 = vpop.f32.mrb[21].mxu0  ;;  %v2351_v15 = vadd.f32 %v2350_v19, %v2349_v10  ;;  %v2404_v49 = vmul.f32 %v7704_v59, %v7704_v59  ;;  %v2356_v31 = vsel %vm469_vm4, %v7704_v59, 0.0 }
 0x31a   : > { %v2352_v25 = vsel %vm469_vm4, %v7706_v14, 0.0  ;;  %v2402_v50 = vmul.f32 %v7706_v14, %v7706_v14  ;;  %v7713_v22 = vpop.f32.mrb[22].mxu0 }
 0x31b   : > { %v2353_v52 = vadd.f32 %v2352_v25, %v2351_v15  ;;  %v2452_v54 = vadd.f32 %v2451_v18, %v2450_v17  ;;  %v7715_v39 = vpop.f32.mrb[23].mxu0  ;;  %v2405_v33 = vmul.f32 %v7713_v22, %v7713_v22  ;;  %v2457_v36 = vsel %vm469_vm4, %v2404_v49, 0.0 }
 0x31c   : > { %v2453_v55 = vsel %vm469_vm4, %v2402_v50, 0.0  ;;  %v2354_v12 = vsel %vm469_vm4, %v7715_v39, 0.0  ;;  %v2403_v51 = vmul.f32 %v7715_v39, %v7715_v39  ;;  %v2358_v29 = vsel %vm469_vm4, %v7713_v22, 0.0 }
 0x31d   : > { %v2454_v1 = vadd.f32 %v2453_v55, %v2452_v54  ;;  %v2355_v62 = vadd.f32 %v2354_v12, %v2353_v52  ;;  %v2459_v47 = vsel %vm469_vm4, %v2405_v33, 0.0 }
 0x31e   : > { %v2455_v13 = vsel %vm469_vm4, %v2403_v51, 0.0 }
 0x31f   : > { %v2357_v38 = vadd.f32 %v2356_v31, %v2355_v62  ;;  %v2456_v23 = vadd.f32 %v2455_v13, %v2454_v1 }
 0x320   : > { %v7732_v57 = vpop.f32.mrb[24].mxu0 }
 0x321   : > { %v2458_v48 = vadd.f32 %v2457_v36, %v2456_v23  ;;  %v7734_v37 = vpop.f32.mrb[25].mxu0  ;;  %v2359_v46 = vadd.f32 %v2358_v29, %v2357_v38  ;;  %v2408_v61 = vmul.f32 %v7732_v57, %v7732_v57  ;;  %v2364_v17 = vsel %vm469_vm4, %v7732_v57, 0.0 }
 0x322   : > { %v2360_v45 = vsel %vm469_vm4, %v7734_v37, 0.0  ;;  %v2406_v53 = vmul.f32 %v7734_v37, %v7734_v37  ;;  %v7741_v56 = vpop.f32.mrb[26].mxu0 }
 0x323   : > { %v2361_v32 = vadd.f32 %v2360_v45, %v2359_v46  ;;  %v2460_v28 = vadd.f32 %v2459_v47, %v2458_v48  ;;  %v7743_v0 = vpop.f32.mrb[27].mxu0  ;;  %v2409_v15 = vmul.f32 %v7741_v56, %v7741_v56  ;;  %v2465_v52 = vsel %vm469_vm4, %v2408_v61, 0.0 }
 0x324   : > { %v2461_v2 = vsel %vm469_vm4, %v2406_v53, 0.0  ;;  %v2362_v10 = vsel %vm469_vm4, %v7743_v0, 0.0  ;;  %v2407_v35 = vmul.f32 %v7743_v0, %v7743_v0  ;;  %v2366_v54 = vsel %vm469_vm4, %v7741_v56, 0.0 }
 0x325   : > { %v2462_v43 = vadd.f32 %v2461_v2, %v2460_v28  ;;  %v2363_v19 = vadd.f32 %v2362_v10, %v2361_v32  ;;  %v2467_v1 = vsel %vm469_vm4, %v2409_v15, 0.0 }
 0x326   : > { %v2463_v18 = vsel %vm469_vm4, %v2407_v35, 0.0 }
 0x327   : > { %v2365_v25 = vadd.f32 %v2364_v17, %v2363_v19  ;;  %v2464_v50 = vadd.f32 %v2463_v18, %v2462_v43 }
 0x328   : > { %v7760_v49 = vpop.f32.mrb[28].mxu0 }
 0x329   : > { %v2466_v55 = vadd.f32 %v2465_v52, %v2464_v50  ;;  %v7762_v12 = vpop.f32.mrb[29].mxu0  ;;  %v2367_v51 = vadd.f32 %v2366_v54, %v2365_v25  ;;  %v2412_v36 = vmul.f32 %v7760_v49, %v7760_v49  ;;  %v2372_v53 = vsel %vm469_vm4, %v7760_v49, 0.0 }
 0x32a   : > { %v2368_v62 = vsel %vm469_vm4, %v7762_v12, 0.0  ;;  %v2410_v31 = vmul.f32 %v7762_v12, %v7762_v12  ;;  %v7769_v33 = vpop.f32.mrb[30].mxu0 }
 0x32b   : > { %v2369_v13 = vadd.f32 %v2368_v62, %v2367_v51  ;;  %v2468_v38 = vadd.f32 %v2467_v1, %v2466_v55  ;;  %v7771_v23 = vpop.f32.mrb[31].mxu0  ;;  %v2413_v32 = vmul.f32 %v7769_v33, %v7769_v33  ;;  %v2473_v10 = vsel %vm469_vm4, %v2412_v36, 0.0 }
 0x32c   : > { %v2469_v29 = vsel %vm469_vm4, %v2410_v31, 0.0  ;;  %v2370_v48 = vsel %vm469_vm4, %v7771_v23, 0.0  ;;  %v2411_v46 = vmul.f32 %v7771_v23, %v7771_v23  ;;  %v2374_v35 = vsel %vm469_vm4, %v7769_v33, 0.0 }
 0x32d   : > { %v2470_v47 = vadd.f32 %v2469_v29, %v2468_v38  ;;  %v2371_v45 = vadd.f32 %v2370_v48, %v2369_v13  ;;  %v2475_v17 = vsel %vm469_vm4, %v2413_v32, 0.0 }
 0x32e   : > { %v2471_v28 = vsel %vm469_vm4, %v2411_v46, 0.0 }
 0x32f   : > { %v2373_v61 = vadd.f32 %v2372_v53, %v2371_v45  ;;  %v2472_v2 = vadd.f32 %v2471_v28, %v2470_v47 }
 0x331   : > { %v2375_v43 = vadd.f32 %v2374_v35, %v2373_v61  ;;  %v2474_v19 = vadd.f32 %v2473_v10, %v2472_v2 }
 0x333   : > { %v2376_v15 = vrot.slane %v2375_v43, 4  ;;  %v2476_v18 = vadd.f32 %v2475_v17, %v2474_v19 }
 0x335   : > { %v2377_v25 = vadd.f32 %v2376_v15, %v2375_v43  ;;  %v2477_v50 = vrot.slane %v2476_v18, 4 }
 0x337   : > { %v2378_v52 = vrot.slane %v2377_v25, 2  ;;  %v2478_v54 = vadd.f32 %v2477_v50, %v2476_v18 }
 0x339   : > { %v2379_v55 = vadd.f32 %v2378_v52, %v2377_v25  ;;  %v2479_v51 = vrot.slane %v2478_v54, 2 }
 0x33b   : > { %v2380_v1 = vrot.slane %v2379_v55, 1  ;;  %v2480_v62 = vadd.f32 %v2479_v51, %v2478_v54 }
 0x33d   : > { %v2381_v31 = vadd.f32 %v2380_v1, %v2379_v55  ;;  %v2481_v13 = vrot.slane %v2480_v62, 1 }
 0x33f   : > { %v2482_v38 = vadd.f32 %v2481_v13, %v2480_v62  ;;  %v7789_v36 = vmul.f32 0.00390625, %v2381_v31 }
 0x341   : > { %v2484_v29 = vmul.f32 0.00390625, %v2482_v38  ;;  %v2485_v48 = vmul.f32 %v7789_v36, %v7789_v36  ;;  %v2516_v46 = vsub.f32 %v7762_v12, %v7789_v36  ;;  %v2517_v47 = vsub.f32 %v7771_v23, %v7789_v36 }
 0x342   : > { %v2488_v45 = vsub.f32 %v7567_v9, %v7789_v36  ;;  %v2489_v53 = vsub.f32 %v7573_v30, %v7789_v36  ;;  %v2490_v32 = vsub.f32 %v7563_v6, %v7789_v36  ;;  %v2491_v28 = vsub.f32 %v7571_v11, %v7789_v36 }
 0x343   : > { %v2486_v61 = vsub.f32 %v2484_v29, %v2485_v48  ;;  %v2492_v2 = vsub.f32 %v7594_v26, %v7789_v36  ;;  %v2493_v12 = vsub.f32 %v7603_v58, %v7789_v36  ;;  %v2494_v23 = vsub.f32 %v7592_v21, %v7789_v36 }
 0x344   : > { %v2495_v9 = vsub.f32 %v7601_v42, %v7789_v36  ;;  %v2496_v30 = vsub.f32 %v7622_v5, %v7789_v36  ;;  %v2497_v6 = vsub.f32 %v7631_v44, %v7789_v36  ;;  %v2498_v11 = vsub.f32 %v7620_v24, %v7789_v36 }
 0x345   : > { %v2487_v10 = vmax.f32 %v2486_v61, 0.0  ;;  %v2499_v26 = vsub.f32 %v7629_v4, %v7789_v36  ;;  %v2500_v58 = vsub.f32 %v7650_v20, %v7789_v36  ;;  %v2501_v21 = vsub.f32 %v7659_v34, %v7789_v36 }
 0x346   : > { %v2502_v42 = vsub.f32 %v7648_v63, %v7789_v36  ;;  %v2503_v5 = vsub.f32 %v7657_v41, %v7789_v36  ;;  %v2504_v44 = vsub.f32 %v7678_v3, %v7789_v36  ;;  %v2505_v24 = vsub.f32 %v7687_v40, %v7789_v36 }
 0x347   : > { %v2520_v35 = vadd.f32 1e-05, %v2487_v10  ;;  %v2506_v4 = vsub.f32 %v7676_v7, %v7789_v36  ;;  %v2507_v20 = vsub.f32 %v7685_v8, %v7789_v36  ;;  %v2508_v34 = vsub.f32 %v7706_v14, %v7789_v36 }
 0x348   : > { %v2509_v63 = vsub.f32 %v7715_v39, %v7789_v36  ;;  %v2510_v41 = vsub.f32 %v7704_v59, %v7789_v36  ;;  %v2511_v3 = vsub.f32 %v7713_v22, %v7789_v36  ;;  %v2512_v40 = vsub.f32 %v7734_v37, %v7789_v36 }
 0x349   : > { %6820 = vrsqrt.f32 %v2520_v35  ;;  %v2513_v7 = vsub.f32 %v7743_v0, %v7789_v36  ;;  %v2514_v8 = vsub.f32 %v7732_v57, %v7789_v36  ;;  %v2515_v14 = vsub.f32 %v7741_v56, %v7789_v36 }
 0x34a   : > { %v2518_v39 = vsub.f32 %v7760_v49, %v7789_v36  ;;  %v2519_v59 = vsub.f32 %v7769_v33, %v7789_v36 }
 0x353   : > { %v6821_v22 = vpop.eup %6820 }
 0x354   : > { %v2550_v43 = vmul.f32 %v6821_v22, %v2516_v46  ;;  %v2551_v19 = vmul.f32 %v6821_v22, %v2517_v47  ;;  %v7857_v37 = vmul.f32 %v6821_v22, %v2488_v45  ;;  %v7859_v17 = vmul.f32 %v6821_v22, %v2489_v53 }
 0x355   : > { %v7861_v0 = vmul.f32 %v6821_v22, %v2490_v32  ;;  %v2525_v15 = vmul.f32 %v6821_v22, %v2491_v28  ;;  %v2526_v57 = vmul.f32 %v6821_v22, %v2492_v2  ;;  %v2527_v18 = vmul.f32 %v6821_v22, %v2493_v12 }
 0x356   : > { %v2582_v25 = vmax.f32 %v2550_v43, 0.0  ;;  %v2583_v56 = vmax.f32 %v2551_v19, 0.0  ;;  %v2528_v50 = vmul.f32 %v6821_v22, %v2494_v23  ;;  %v2529_v52 = vmul.f32 %v6821_v22, %v2495_v9 }
 0x357   : > { %v2530_v49 = vmul.f32 %v6821_v22, %v2496_v30  ;;  %v2531_v54 = vmul.f32 %v6821_v22, %v2497_v6  ;;  %v2532_v55 = vmul.f32 %v6821_v22, %v2498_v11  ;;  %v2533_v33 = vmul.f32 %v6821_v22, %v2499_v26 }
 0x358   : > { %v7863_v51 = vpack.c.bf16 %v2583_v56, %v2582_v25  ;;  %v2534_v1 = vmul.f32 %v6821_v22, %v2500_v58  ;;  %v2535_v62 = vmul.f32 %v6821_v22, %v2501_v21  ;;  %v2536_v31 = vmul.f32 %v6821_v22, %v2502_v42 }
 0x359   : > { %v2537_v13 = vmul.f32 %v6821_v22, %v2503_v5  ;;  %v2538_v38 = vmul.f32 %v6821_v22, %v2504_v44  ;;  %v2539_v36 = vmul.f32 %v6821_v22, %v2505_v24  ;;  %v2540_v29 = vmul.f32 %v6821_v22, %v2506_v4 }
 0x35a   : > { %8949 = vst [vmem:[#allocation3_spill] sm:$0xff] %v7863_v51  ;;  %v2541_v48 = vmul.f32 %v6821_v22, %v2507_v20  ;;  %v2542_v46 = vmul.f32 %v6821_v22, %v2508_v34  ;;  %v2543_v47 = vmul.f32 %v6821_v22, %v2509_v63  ;;  %v2544_v45 = vmul.f32 %v6821_v22, %v2510_v41 }
 0x35b   : > { %v2545_v53 = vmul.f32 %v6821_v22, %v2511_v3  ;;  %v2546_v32 = vmul.f32 %v6821_v22, %v2512_v40  ;;  %v2547_v28 = vmul.f32 %v6821_v22, %v2513_v7  ;;  %v2548_v61 = vmul.f32 %v6821_v22, %v2514_v8 }
 0x35c   : > { %v2549_v2 = vmul.f32 %v6821_v22, %v2515_v14  ;;  %v2552_v12 = vmul.f32 %v6821_v22, %v2518_v39  ;;  %v2553_v23 = vmul.f32 %v6821_v22, %v2519_v59  ;;  %v2554_v9 = vmax.f32 %v7857_v37, 0.0 }
 0x35d   : > { %v2555_v30 = vmax.f32 %v7859_v17, 0.0  ;;  %v2556_v6 = vmax.f32 %v7861_v0, 0.0  ;;  %v2557_v11 = vmax.f32 %v2525_v15, 0.0  ;;  %v2558_v10 = vmax.f32 %v2526_v57, 0.0 }
 0x35e   : > { %v2559_v26 = vmax.f32 %v2527_v18, 0.0  ;;  %v2560_v58 = vmax.f32 %v2528_v50, 0.0  ;;  %v2561_v21 = vmax.f32 %v2529_v52, 0.0  ;;  %v2562_v42 = vmax.f32 %v2530_v49, 0.0 }
 0x35f   : > { %v2563_v5 = vmax.f32 %v2531_v54, 0.0  ;;  %v2564_v44 = vmax.f32 %v2532_v55, 0.0  ;;  %v2565_v24 = vmax.f32 %v2533_v33, 0.0  ;;  %v2566_v35 = vmax.f32 %v2534_v1, 0.0 }
 0x360   : > { %v2567_v4 = vmax.f32 %v2535_v62, 0.0  ;;  %v2568_v20 = vmax.f32 %v2536_v31, 0.0  ;;  %v2569_v34 = vmax.f32 %v2537_v13, 0.0  ;;  %v2570_v63 = vmax.f32 %v2538_v38, 0.0 }
 0x361   : > { %v2571_v41 = vmax.f32 %v2539_v36, 0.0  ;;  %v2572_v3 = vmax.f32 %v2540_v29, 0.0  ;;  %v2573_v40 = vmax.f32 %v2541_v48, 0.0  ;;  %v2574_v7 = vmax.f32 %v2542_v46, 0.0 }
 0x362   : > { %v2575_v8 = vmax.f32 %v2543_v47, 0.0  ;;  %v2576_v14 = vmax.f32 %v2544_v45, 0.0  ;;  %v2577_v39 = vmax.f32 %v2545_v53, 0.0  ;;  %v2578_v59 = vmax.f32 %v2546_v32, 0.0 }
 0x363   : > { %v2579_v22 = vmax.f32 %v2547_v28, 0.0  ;;  %v2580_v43 = vmax.f32 %v2548_v61, 0.0  ;;  %v2581_v19 = vmax.f32 %v2549_v2, 0.0  ;;  %v2584_v37 = vmax.f32 %v2552_v12, 0.0 }
 0x364   : > { %v2585_v17 = vmax.f32 %v2553_v23, 0.0  ;;  %v7868_v0 = vpack.c.bf16 %v2555_v30, %v2554_v9  ;;  %v7870_v15 = vpack.c.bf16 %v2557_v11, %v2556_v6  ;;  %v7872_v57 = vpack.c.bf16 %v2559_v26, %v2558_v10 }
 0x365   : > { %v7874_v18 = vpack.c.bf16 %v2561_v21, %v2560_v58  ;;  %v7876_v25 = vpack.c.bf16 %v2563_v5, %v2562_v42  ;;  %v7878_v56 = vpack.c.bf16 %v2565_v24, %v2564_v44  ;;  %v7880_v50 = vpack.c.bf16 %v2567_v4, %v2566_v35  ;;  %v7950_v42 = vld [vmem:[%s8913_s2 + $0xc] sm:$0x3] }
 0x366   : > { %v7882_v52 = vpack.c.bf16 %v2569_v34, %v2568_v20  ;;  %v7884_v49 = vpack.c.bf16 %v2571_v41, %v2570_v63  ;;  %v7886_v54 = vpack.c.bf16 %v2573_v40, %v2572_v3  ;;  %v7888_v55 = vpack.c.bf16 %v2575_v8, %v2574_v7 }
 0x367   : > { %v7890_v33 = vpack.c.bf16 %v2577_v39, %v2576_v14  ;;  %v7892_v1 = vpack.c.bf16 %v2579_v22, %v2578_v59  ;;  %v7894_v62 = vpack.c.bf16 %v2581_v19, %v2580_v43  ;;  %v7896_v31 = vpack.c.bf16 %v2585_v17, %v2584_v37 }
 0x368   : > { %v2606_v13 = vshrl.u32 %v7868_v0, 16  ;;  %v7900_v38 = vshll.u32 %v7868_v0, 16  ;;  %v7903_v36 = vshrl.u32 %v7870_v15, 16  ;;  %v7906_v29 = vshrl.u32 %v7872_v57, 16 }
 0x369   : > { %8950 = vst [vmem:[#allocation6_spill] sm:$0xff] %v7890_v33  ;;  %8951 = vst [vmem:[#allocation2_spill] sm:$0xff] %v7892_v1  ;;  %v7911_v45 = vshll.u32 %v7870_v15, 16  ;;  %v7915_v32 = vshll.u32 %v7872_v57, 16  ;;  %v7918_v28 = vshrl.u32 %v7874_v18, 16  ;;  %v7921_v61 = vshrl.u32 %v7876_v25, 16 }
 0x36a   : > { %8952 = vst [vmem:[#allocation4_spill] sm:$0xff] %v7894_v62  ;;  %v2670_v48 = vrot.slane %v2606_v13, 7  ;;  %v2764_v46 = vrot.slane %v7900_v38, 1  ;;  %v2666_v47 = vrot.slane %v7903_v36, 7  ;;  %v2674_v53 = vrot.slane %v7906_v29, 7 }
 0x36b   : > { %v7926_v9 = vshrl.u32 %v7878_v56, 16  ;;  %v3058_v10 = vsel %vm518_vm0, %v7561_v60, 0  ;;  %v7941_v26 = vshrl.u32 %v7880_v50, 16  ;;  %v2678_v58 = vrot.slane %v7918_v28, 7 }
 0x36c   : > { %v2673_v2 = vor.u32 %v7900_v38, %v2670_v48  ;;  %v2765_v12 = vor.u32 %v2764_v46, %v2606_v13  ;;  %v2669_v23 = vor.u32 %v7911_v45, %v2666_v47  ;;  %v2677_v30 = vor.u32 %v7915_v32, %v2674_v53 }
 0x36d   : > { %v2682_v21 = vrot.slane %v7921_v61, 7  ;;  %v2686_v5 = vrot.slane %v7926_v9, 7  ;;  %v2679_v44 = vshll.u32 %v7874_v18, 16  ;;  %v2683_v24 = vshll.u32 %v7876_v25, 16 }
 0x36e   : > { %v7931_v6 = vsel %vm6954_vm3, %v2606_v13, %v2673_v2  ;;  %v7936_v11 = vsel %vm6954_vm3, %v7903_v36, %v2669_v23  ;;  %v7957_v60 = vsel %vm6954_vm3, %v7906_v29, %v2677_v30  ;;  %v2690_v35 = vrot.slane %v7941_v26, 7 }
 0x36f   : > { %5978 = vmatprep.mubr.msk.bf16.mxu1 %vm469_vm4, %v7931_v6  ;;  %v2687_v4 = vshll.u32 %v7878_v56, 16  ;;  %v7967_v20 = vshrl.u32 %v7882_v52, 16  ;;  %v7970_v34 = vshrl.u32 %v7884_v49, 16  ;;  %v2681_v63 = vor.u32 %v2679_v44, %v2678_v58 }
 0x370   : > { %5979 = vmatmul.mubr.msk.bf16.vlgmr.msra.gmra.mrb[0].mxu1 %vm469_vm4, %v7936_v11  ;;  %v2685_v41 = vor.u32 %v2683_v24, %v2682_v21  ;;  %v2691_v3 = vshll.u32 %v7880_v50, 16  ;;  %v2695_v22 = vshll.u32 %v7882_v52, 16  ;;  %v2699_v19 = vshll.u32 %v7884_v49, 16 }
 0x371   : > { %6011 = vmatpush3.bf16.msra.mxu1 %v3058_v10  ;;  %5982 = vmatprep.mubr.msk.bf16.mxu1 %vm469_vm4, %v7957_v60  ;;  %v2689_v40 = vor.u32 %v2687_v4, %v2686_v5  ;;  %v2694_v8 = vrot.slane %v7967_v20, 7  ;;  %v2698_v14 = vrot.slane %v7970_v34, 7  ;;  %v7980_v39 = vsel %vm6954_vm3, %v7918_v28, %v2681_v63 }
 0x372   : > { %6805 = vmatprep.subr.msk.bf16.mxu1 %vm518_vm0, %v7950_v42  ;;  %v2693_v7 = vor.u32 %v2691_v3, %v2690_v35  ;;  %v7985_v59 = vsel %vm6954_vm3, %v7921_v61, %v2685_v41  ;;  %v7997_v37 = vshrl.u32 %v7886_v54, 16  ;;  %v8000_v17 = vshll.u32 %v7886_v54, 16 }
 0x373   : > { %v7993_v43 = vsel %vm6954_vm3, %v7926_v9, %v2689_v40  ;;  %v8010_v48 = vshrl.u32 %v7888_v55, 16  ;;  %v8013_v46 = vshll.u32 %v7888_v55, 16  ;;  %v8016_v47 = vshrl.u32 %v7890_v33, 16 }
 0x374   : > { %v8007_v13 = vsel %vm6954_vm3, %v7941_v26, %v2693_v7  ;;  %v2697_v53 = vor.u32 %v2695_v22, %v2694_v8  ;;  %v2701_v2 = vor.u32 %v2699_v19, %v2698_v14  ;;  %v8019_v23 = vshll.u32 %v7890_v33, 16 }
 0x375   : > { %v8022_v30 = vshrl.u32 %v7892_v1, 16  ;;  %v8025_v10 = vshll.u32 %v7892_v1, 16  ;;  %v8028_v58 = vshrl.u32 %v7894_v62, 16  ;;  %v2762_v21 = vrot.slane %v7911_v45, 1 }
 0x376   : > { %v8034_v5 = vsel %vm7389_vm7, %v2765_v12, %v7900_v38  ;;  %v8037_v35 = vshll.u32 %v7894_v62, 16  ;;  %v8040_v63 = vshrl.u32 %v7863_v51, 16  ;;  %v2766_v41 = vrot.slane %v7915_v32, 1 }
 0x377   : > { %8953 = vst [vmem:[#allocation7_spill] sm:$0xff] %v8034_v5  ;;  %v2768_v40 = vrot.slane %v2679_v44, 1  ;;  %v8044_v7 = vshll.u32 %v7863_v51, 16  ;;  %v2763_v8 = vor.u32 %v2762_v21, %v7903_v36  ;;  %v2770_v14 = vrot.slane %v2683_v24, 1 }
 0x378   : > { %5983 = vmatmul.mubr.msk.bf16.gmra.mrb[4].mxu1 %vm469_vm4, %v7980_v39  ;;  %v2772_v1 = vrot.slane %v2687_v4, 1  ;;  %v8048_v33 = vshrl.u32 %v7896_v31, 16  ;;  %v2767_v38 = vor.u32 %v2766_v41, %v7906_v29  ;;  %v2774_v5 = vrot.slane %v2691_v3, 1 }
 0x379   : > { %5986 = vmatprep.mubr.msk.bf16.mxu1 %vm469_vm4, %v7985_v59  ;;  %v2769_v12 = vor.u32 %v2768_v40, %v7918_v28  ;;  %v8053_v62 = vshll.u32 %v7896_v31, 16  ;;  %v8058_v51 = vsel %vm7389_vm7, %v2763_v8, %v7911_v45  ;;  %v2771_v36 = vor.u32 %v2770_v14, %v7921_v61 }
 0x37a   : > { %v2773_v21 = vor.u32 %v2772_v1, %v7926_v9  ;;  %v8067_v29 = vsel %vm7389_vm7, %v2767_v38, %v7915_v32  ;;  %v2775_v41 = vor.u32 %v2774_v5, %v7941_v26  ;;  %v2776_v45 = vrot.slane %v2695_v22, 1 }
 0x37b   : > { %v8071_v28 = vsel %vm7389_vm7, %v2769_v12, %v2679_v44  ;;  %v8078_v1 = vsel %vm7389_vm7, %v2771_v36, %v2683_v24  ;;  %v2778_v32 = vrot.slane %v2699_v19, 1  ;;  %v2780_v9 = vrot.slane %v8000_v17, 1 }
 0x37c   : > { %v8082_v61 = vsel %vm7389_vm7, %v2773_v21, %v2687_v4  ;;  %v8087_v44 = vsel %vm7389_vm7, %v2775_v41, %v2691_v3  ;;  %v2777_v26 = vor.u32 %v2776_v45, %v7967_v20  ;;  %v2782_v5 = vrot.slane %v8013_v46, 1 }
 0x37d   : > { %v2784_v40 = vrot.slane %v8019_v23, 1  ;;  %v2779_v24 = vor.u32 %v2778_v32, %v7970_v34  ;;  %v2781_v8 = vor.u32 %v2780_v9, %v7997_v37  ;;  %v2786_v4 = vrot.slane %v8025_v10, 1 }
 0x37e   : > { %v2788_v14 = vrot.slane %v8037_v35, 1  ;;  %v8098_v38 = vsel %vm7389_vm7, %v2777_v26, %v2695_v22  ;;  %v2783_v3 = vor.u32 %v2782_v5, %v8010_v48  ;;  %v2790_v36 = vrot.slane %v8044_v7, 1 }
 0x37f   : > { %v2785_v12 = vor.u32 %v2784_v40, %v8016_v47  ;;  %v8105_v21 = vsel %vm7389_vm7, %v2779_v24, %v2699_v19  ;;  %v8110_v41 = vsel %vm7389_vm7, %v2781_v8, %v8000_v17  ;;  %v2787_v45 = vor.u32 %v2786_v4, %v8022_v30 }
 0x380   : > { %5987 = vmatmul.mubr.msk.bf16.gmra.mrb[8].mxu1 %vm469_vm4, %v7993_v43  ;;  %v2789_v22 = vor.u32 %v2788_v14, %v8028_v58  ;;  %v8117_v32 = vsel %vm7389_vm7, %v2783_v3, %v8013_v46  ;;  %v2791_v19 = vor.u32 %v2790_v36, %v8040_v63  ;;  %v2792_v26 = vrot.slane %v8053_v62, 1 }
 0x381   : > { %5990 = vmatprep.mubr.msk.bf16.mxu1 %vm469_vm4, %v8007_v13  ;;  %v8122_v9 = vsel %vm7389_vm7, %v2785_v12, %v8019_v23  ;;  %v8129_v5 = vsel %vm6954_vm3, %v7967_v20, %v2697_v53  ;;  %v2702_v40 = vrot.slane %v7997_v37, 7  ;;  %v8135_v24 = vsel %vm7389_vm7, %v2787_v45, %v8025_v10 }
 0x382   : > { %v8140_v8 = vsel %vm7389_vm7, %v2789_v22, %v8037_v35  ;;  %v8147_v20 = vsel %vm6954_vm3, %v7970_v34, %v2701_v2  ;;  %v2706_v53 = vrot.slane %v8010_v48, 7  ;;  %v8153_v4 = vsel %vm7389_vm7, %v2791_v19, %v8044_v7 }
 0x383   : > { %v2793_v14 = vor.u32 %v2792_v26, %v8048_v33  ;;  %v2705_v34 = vor.u32 %v8000_v17, %v2702_v40  ;;  %v2710_v36 = vrot.slane %v8016_v47, 7  ;;  %v2714_v16 = vrot.slane %v8022_v30, 7 }
 0x384   : > { %v2709_v2 = vor.u32 %v8013_v46, %v2706_v53  ;;  %v2718_v22 = vrot.slane %v8028_v58, 7  ;;  %v2722_v19 = vrot.slane %v8040_v63, 7  ;;  %v2726_v26 = vrot.slane %v8048_v33, 7 }
 0x385   : > { %v8161_v3 = vsel %vm7389_vm7, %v2793_v14, %v8053_v62  ;;  %v2755_v12 = vsel %vm6954_vm3, %v7997_v37, %v2705_v34  ;;  %v2713_v17 = vor.u32 %v8019_v23, %v2710_v36  ;;  %v2717_v46 = vor.u32 %v8025_v10, %v2714_v16 }
 0x386   : > { %v2756_v45 = vsel %vm6954_vm3, %v8010_v48, %v2709_v2  ;;  %v2721_v23 = vor.u32 %v8037_v35, %v2718_v22  ;;  %v2725_v10 = vor.u32 %v8044_v7, %v2722_v19  ;;  %v2729_v40 = vor.u32 %v8053_v62, %v2726_v26 }
 0x387   : > { %v2757_v37 = vsel %vm6954_vm3, %v8016_v47, %v2713_v17  ;;  %v2758_v48 = vsel %vm6954_vm3, %v8022_v30, %v2717_v46 }
 0x388   : > { %5991 = vmatmul.mubr.msk.bf16.gmra.mrb[12].mxu1 %vm469_vm4, %v8129_v5  ;;  %v2759_v47 = vsel %vm6954_vm3, %v8028_v58, %v2721_v23  ;;  %v2760_v30 = vsel %vm6954_vm3, %v8040_v63, %v2725_v10  ;;  %v2761_v35 = vsel %vm6954_vm3, %v8048_v33, %v2729_v40  ;;  %v3224_v58 = vsel %vm518_vm0, %v7950_v42, 0  ;;  %v5258_v63 = vld [vmem:[%s8913_s2 + $0x2] sm:$0x3]  ;;  %v5275_v33 = vld [vmem:[%s8913_s2 + $0x8] sm:$0x3] }
 0x389   : > { %5994 = vmatprep.mubr.msk.bf16.mxu1 %vm469_vm4, %v8147_v20  ;;  %v3452_v27 = vsel %vm518_vm0, %v5258_v63, 0  ;;  %v3652_v62 = vsel %vm518_vm0, %v5275_v33, 0  ;;  %v8955_v42 = vld [vmem:[#allocation2_spill] sm:$0xff] }
 0x390   : > { %5995 = vmatmul.mubr.msk.bf16.gmra.mrb[16].mxu1 %vm469_vm4, %v2755_v12 }
 0x391   : > { %5998 = vmatprep.mubr.msk.bf16.mxu1 %vm469_vm4, %v2756_v45 }
 0x398   : > { %5999 = vmatmul.mubr.msk.bf16.gmra.mrb[20].mxu1 %vm469_vm4, %v2757_v37 }
 0x399   : > { %6002 = vmatprep.mubr.msk.bf16.mxu1 %vm469_vm4, %v2758_v48 }
 0x3a0   : > { %6003 = vmatmul.mubr.msk.bf16.gmra.mrb[24].mxu1 %vm469_vm4, %v2759_v47 }
 0x3a1   : > { %6006 = vmatprep.mubr.msk.bf16.mxu1 %vm469_vm4, %v2760_v30 }
 0x3a8   : > { %6007 = vmatmul.mubr.msk.bf16.gmra.mrb[28].mxu1 %vm469_vm4, %v2761_v35 }
 0x3a9   : > { %6012 = vmatprep.mubr.msk.bf16.mxu1 %vm469_vm4, %v7936_v11 }
 0x3b0   : > { %6013 = vmatmul.mubr.msk.bf16.vlgmr.msra.gmra.mrb[0].mxu1 %vm469_vm4, %v7931_v6  ;;  %v5292_v6 = vld [vmem:[%s8913_s2 + $0xe] sm:$0x3] }
 0x3b1   : > { %6045 = vmatpush3.bf16.msra.mxu1 %v3224_v58  ;;  %6016 = vmatprep.mubr.msk.bf16.mxu1 %vm469_vm4, %v7936_v11 }
 0x3b2   : > { %6806 = vmatprep.subr.msk.bf16.mxu1 %vm518_vm0, %v5258_v63 }
 0x3b8   : > { %6017 = vmatmul.mubr.msk.bf16.gmra.mrb[4].mxu1 %vm469_vm4, %v7957_v60 }
 0x3b9   : > { %6020 = vmatprep.mubr.msk.bf16.mxu1 %vm469_vm4, %v7980_v39 }
 0x3c0   : > { %6021 = vmatmul.mubr.msk.bf16.gmra.mrb[8].mxu1 %vm469_vm4, %v7985_v59 }
 0x3c1   : > { %6024 = vmatprep.mubr.msk.bf16.mxu1 %vm469_vm4, %v7993_v43 }
 0x3c8   : > { %6025 = vmatmul.mubr.msk.bf16.gmra.mrb[12].mxu1 %vm469_vm4, %v8007_v13 }
 0x3c9   : > { %6028 = vmatprep.mubr.msk.bf16.mxu1 %vm469_vm4, %v8129_v5 }
 0x3d0   : > { %6029 = vmatmul.mubr.msk.bf16.gmra.mrb[16].mxu1 %vm469_vm4, %v8147_v20 }
 0x3d1   : > { %6032 = vmatprep.mubr.msk.bf16.mxu1 %vm469_vm4, %v2755_v12 }
 0x3d8   : > { %6033 = vmatmul.mubr.msk.bf16.gmra.mrb[20].mxu1 %vm469_vm4, %v2756_v45 }
 0x3d9   : > { %6036 = vmatprep.mubr.msk.bf16.mxu1 %vm469_vm4, %v2757_v37 }
 0x3e0   : > { %6037 = vmatmul.mubr.msk.bf16.gmra.mrb[24].mxu1 %vm469_vm4, %v2758_v48 }
 0x3e1   : > { %6040 = vmatprep.mubr.msk.bf16.mxu1 %vm469_vm4, %v2759_v47 }
 0x3e8   : > { %6041 = vmatmul.mubr.msk.bf16.gmra.mrb[28].mxu1 %vm469_vm4, %v2760_v30 }
 0x3e9   : > { %6046 = vmatprep.mubr.msk.bf16.mxu1 %vm469_vm4, %v7936_v11  ;;  %v8954_v11 = vld [vmem:[#allocation6_spill] sm:$0xff] }
 0x3f0   : > { %6047 = vmatmul.mubr.msk.bf16.vlgmr.msra.gmra.mrb[0].mxu1 %vm469_vm4, %v7957_v60  ;;  %v8956_v60 = vld [vmem:[#allocation4_spill] sm:$0xff] }
 0x3f1   : > { %6079 = vmatpush3.bf16.msra.mxu1 %v3452_v27  ;;  %6050 = vmatprep.mubr.msk.bf16.mxu1 %vm469_vm4, %v7980_v39  ;;  %v8957_v39 = vld [vmem:[#allocation3_spill] sm:$0xff] }
 0x3f2   : > { %6807 = vmatprep.subr.msk.bf16.mxu1 %vm518_vm0, %v5275_v33 }
 0x3f8   : > { %6051 = vmatmul.mubr.msk.bf16.gmra.mrb[4].mxu1 %vm469_vm4, %v7985_v59  ;;  %v3850_v59 = vsel %vm518_vm0, %v5292_v6, 0 }
 0x3f9   : > { %6054 = vmatprep.mubr.msk.bf16.mxu1 %vm469_vm4, %v7993_v43  ;;  %v5309_v43 = vld [vmem:[%s8913_s2 + $0x4] sm:$0x3] }
 0x400   : > { %6055 = vmatmul.mubr.msk.bf16.gmra.mrb[8].mxu1 %vm469_vm4, %v8007_v13  ;;  %v5326_v13 = vld [vmem:[%s8913_s2 + $0xa] sm:$0x3] }
 0x401   : > { %6058 = vmatprep.mubr.msk.bf16.mxu1 %vm469_vm4, %v8129_v5 }
 0x408   : > { %6059 = vmatmul.mubr.msk.bf16.gmra.mrb[12].mxu1 %vm469_vm4, %v8147_v20 }
 0x409   : > { %6062 = vmatprep.mubr.msk.bf16.mxu1 %vm469_vm4, %v2755_v12 }
 0x410   : > { %6063 = vmatmul.mubr.msk.bf16.gmra.mrb[16].mxu1 %vm469_vm4, %v2756_v45 }
 0x411   : > { %6066 = vmatprep.mubr.msk.bf16.mxu1 %vm469_vm4, %v2757_v37 }
 0x418   : > { %6067 = vmatmul.mubr.msk.bf16.gmra.mrb[20].mxu1 %vm469_vm4, %v2758_v48 }
 0x419   : > { %6070 = vmatprep.mubr.msk.bf16.mxu1 %vm469_vm4, %v2759_v47 }
 0x420   : > { %6071 = vmatmul.mubr.msk.bf16.gmra.mrb[24].mxu1 %vm469_vm4, %v2760_v30 }
 0x421   : > { %6074 = vmatprep.mubr.msk.bf16.mxu1 %vm469_vm4, %v2761_v35 }
 0x428   : > { %6075 = vmatmul.mubr.msk.bf16.gmra.mrb[28].mxu1 %vm469_vm4, %v2760_v30 }
 0x429   : > { %6080 = vmatprep.mubr.msk.bf16.mxu1 %vm469_vm4, %v7870_v15 }
 0x430   : > { %6081 = vmatmul.mubr.msk.bf16.vlgmr.msra.gmra.mrb[0].mxu1 %vm469_vm4, %v7868_v0 }
 0x431   : > { %6113 = vmatpush3.bf16.msra.mxu1 %v3652_v62  ;;  %6084 = vmatprep.mubr.msk.bf16.mxu1 %vm469_vm4, %v7870_v15 }
 0x432   : > { %6808 = vmatprep.subr.msk.bf16.mxu1 %vm518_vm0, %v5292_v6 }
 0x438   : > { %6085 = vmatmul.mubr.msk.bf16.gmra.mrb[4].mxu1 %vm469_vm4, %v7872_v57 }
 0x439   : > { %6088 = vmatprep.mubr.msk.bf16.mxu1 %vm469_vm4, %v7874_v18 }
 0x440   : > { %6089 = vmatmul.mubr.msk.bf16.gmra.mrb[8].mxu1 %vm469_vm4, %v7876_v25 }
 0x441   : > { %6092 = vmatprep.mubr.msk.bf16.mxu1 %vm469_vm4, %v7878_v56 }
 0x448   : > { %6093 = vmatmul.mubr.msk.bf16.gmra.mrb[12].mxu1 %vm469_vm4, %v7880_v50 }
 0x449   : > { %6096 = vmatprep.mubr.msk.bf16.mxu1 %vm469_vm4, %v7882_v52 }
 0x450   : > { %6097 = vmatmul.mubr.msk.bf16.gmra.mrb[16].mxu1 %vm469_vm4, %v7884_v49 }
 0x451   : > { %6100 = vmatprep.mubr.msk.bf16.mxu1 %vm469_vm4, %v7886_v54 }
 0x458   : > { %6101 = vmatmul.mubr.msk.bf16.gmra.mrb[20].mxu1 %vm469_vm4, %v7888_v55 }
 0x459   : > { %6104 = vmatprep.mubr.msk.bf16.mxu1 %vm469_vm4, %v8954_v11 }
 0x460   : > { %6105 = vmatmul.mubr.msk.bf16.gmra.mrb[24].mxu1 %vm469_vm4, %v8955_v42 }
 0x461   : > { %6108 = vmatprep.mubr.msk.bf16.mxu1 %vm469_vm4, %v8956_v60 }
 0x468   : > { %6109 = vmatmul.mubr.msk.bf16.gmra.mrb[28].mxu1 %vm469_vm4, %v8957_v39 }
 0x469   : > { %6114 = vmatprep.mubr.msk.bf16.mxu1 %vm469_vm4, %v7868_v0  ;;  %v4093_v0 = vsel %vm518_vm0, %v5309_v43, 0 }
 0x470   : > { %6115 = vmatmul.mubr.msk.bf16.vlgmr.msra.gmra.mrb[0].mxu1 %vm469_vm4, %v7870_v15 }
 0x471   : > { %6147 = vmatpush3.bf16.msra.mxu1 %v3850_v59  ;;  %6118 = vmatprep.mubr.msk.bf16.mxu1 %vm469_vm4, %v7872_v57 }
 0x472   : > { %6809 = vmatprep.subr.msk.bf16.mxu1 %vm518_vm0, %v5309_v43 }
 0x478   : > { %6119 = vmatmul.mubr.msk.bf16.gmra.mrb[4].mxu1 %vm469_vm4, %v7874_v18 }
 0x479   : > { %6122 = vmatprep.mubr.msk.bf16.mxu1 %vm469_vm4, %v7876_v25 }
 0x480   : > { %6123 = vmatmul.mubr.msk.bf16.gmra.mrb[8].mxu1 %vm469_vm4, %v7878_v56 }
 0x481   : > { %6126 = vmatprep.mubr.msk.bf16.mxu1 %vm469_vm4, %v7880_v50 }
 0x488   : > { %6127 = vmatmul.mubr.msk.bf16.gmra.mrb[12].mxu1 %vm469_vm4, %v7882_v52 }
 0x489   : > { %6130 = vmatprep.mubr.msk.bf16.mxu1 %vm469_vm4, %v7884_v49 }
 0x490   : > { %6131 = vmatmul.mubr.msk.bf16.gmra.mrb[16].mxu1 %vm469_vm4, %v7886_v54 }
 0x491   : > { %6134 = vmatprep.mubr.msk.bf16.mxu1 %vm469_vm4, %v7888_v55 }
 0x498   : > { %6135 = vmatmul.mubr.msk.bf16.gmra.mrb[20].mxu1 %vm469_vm4, %v8954_v11 }
 0x499   : > { %6138 = vmatprep.mubr.msk.bf16.mxu1 %vm469_vm4, %v8955_v42 }
 0x4a0   : > { %6139 = vmatmul.mubr.msk.bf16.gmra.mrb[24].mxu1 %vm469_vm4, %v8956_v60 }
 0x4a1   : > { %6142 = vmatprep.mubr.msk.bf16.mxu1 %vm469_vm4, %v8957_v39 }
 0x4a8   : > { %6143 = vmatmul.mubr.msk.bf16.gmra.mrb[28].mxu1 %vm469_vm4, %v7896_v31 }
 0x4a9   : > { %6148 = vmatprep.mubr.msk.bf16.mxu1 %vm469_vm4, %v7870_v15  ;;  %v4294_v15 = vsel %vm518_vm0, %v5326_v13, 0 }
 0x4b0   : > { %6149 = vmatmul.mubr.msk.bf16.vlgmr.msra.gmra.mrb[0].mxu1 %vm469_vm4, %v7872_v57  ;;  %v5343_v57 = vld [vmem:[%s8913_s2 + $0x10] sm:$0x3] }
 0x4b1   : > { %6181 = vmatpush3.bf16.msra.mxu1 %v4093_v0  ;;  %6152 = vmatprep.mubr.msk.bf16.mxu1 %vm469_vm4, %v7874_v18  ;;  %v8958_v18 = vld [vmem:[#allocation7_spill] sm:$0xff] }
 0x4b2   : > { %6810 = vmatprep.subr.msk.bf16.mxu1 %vm518_vm0, %v5326_v13 }
 0x4b8   : > { %6153 = vmatmul.mubr.msk.bf16.gmra.mrb[4].mxu1 %vm469_vm4, %v7876_v25  ;;  %v4492_v25 = vsel %vm518_vm0, %v5343_v57, 0 }
 0x4b9   : > { %6156 = vmatprep.mubr.msk.bf16.mxu1 %vm469_vm4, %v7878_v56 }
 0x4c0   : > { %6157 = vmatmul.mubr.msk.bf16.gmra.mrb[8].mxu1 %vm469_vm4, %v7880_v50 }
 0x4c1   : > { %6160 = vmatprep.mubr.msk.bf16.mxu1 %vm469_vm4, %v7882_v52 }
 0x4c8   : > { %6161 = vmatmul.mubr.msk.bf16.gmra.mrb[12].mxu1 %vm469_vm4, %v7884_v49 }
 0x4c9   : > { %6164 = vmatprep.mubr.msk.bf16.mxu1 %vm469_vm4, %v7886_v54 }
 0x4d0   : > { %6165 = vmatmul.mubr.msk.bf16.gmra.mrb[16].mxu1 %vm469_vm4, %v7888_v55 }
 0x4d1   : > { %6168 = vmatprep.mubr.msk.bf16.mxu1 %vm469_vm4, %v8954_v11 }
 0x4d8   : > { %6169 = vmatmul.mubr.msk.bf16.gmra.mrb[20].mxu1 %vm469_vm4, %v8955_v42 }
 0x4d9   : > { %6172 = vmatprep.mubr.msk.bf16.mxu1 %vm469_vm4, %v8956_v60 }
 0x4e0   : > { %6173 = vmatmul.mubr.msk.bf16.gmra.mrb[24].mxu1 %vm469_vm4, %v8957_v39 }
 0x4e1   : > { %6176 = vmatprep.mubr.msk.bf16.mxu1 %vm469_vm4, %v7896_v31 }
 0x4e8   : > { %6177 = vmatmul.mubr.msk.bf16.gmra.mrb[28].mxu1 %vm469_vm4, %v8957_v39 }
 0x4e9   : > { %6182 = vmatprep.mubr.msk.bf16.mxu1 %vm469_vm4, %v8058_v51 }
 0x4f0   : > { %6183 = vmatmul.mubr.msk.bf16.vlgmr.msra.gmra.mrb[0].mxu1 %vm469_vm4, %v8958_v18 }
 0x4f1   : > { %6215 = vmatpush3.bf16.msra.mxu1 %v4294_v15  ;;  %6186 = vmatprep.mubr.msk.bf16.mxu1 %vm469_vm4, %v8058_v51 }
 0x4f2   : > { %6811 = vmatprep.subr.msk.bf16.mxu1 %vm518_vm0, %v5343_v57 }
 0x4f8   : > { %6187 = vmatmul.mubr.msk.bf16.gmra.mrb[4].mxu1 %vm469_vm4, %v8067_v29 }
 0x4f9   : > { %6190 = vmatprep.mubr.msk.bf16.mxu1 %vm469_vm4, %v8071_v28 }
 0x500   : > { %6191 = vmatmul.mubr.msk.bf16.gmra.mrb[8].mxu1 %vm469_vm4, %v8078_v1 }
 0x501   : > { %6194 = vmatprep.mubr.msk.bf16.mxu1 %vm469_vm4, %v8082_v61 }
 0x508   : > { %6195 = vmatmul.mubr.msk.bf16.gmra.mrb[12].mxu1 %vm469_vm4, %v8087_v44 }
 0x509   : > { %6198 = vmatprep.mubr.msk.bf16.mxu1 %vm469_vm4, %v8098_v38 }
 0x510   : > { %6199 = vmatmul.mubr.msk.bf16.gmra.mrb[16].mxu1 %vm469_vm4, %v8105_v21 }
 0x511   : > { %6202 = vmatprep.mubr.msk.bf16.mxu1 %vm469_vm4, %v8110_v41 }
 0x518   : > { %6203 = vmatmul.mubr.msk.bf16.gmra.mrb[20].mxu1 %vm469_vm4, %v8117_v32 }
 0x519   : > { %6206 = vmatprep.mubr.msk.bf16.mxu1 %vm469_vm4, %v8122_v9 }
 0x520   : > { %6207 = vmatmul.mubr.msk.bf16.gmra.mrb[24].mxu1 %vm469_vm4, %v8135_v24 }
 0x521   : > { %6210 = vmatprep.mubr.msk.bf16.mxu1 %vm469_vm4, %v8140_v8 }
 0x528   : > { %6211 = vmatmul.mubr.msk.bf16.gmra.mrb[28].mxu1 %vm469_vm4, %v8153_v4 }
 0x529   : > { %6216 = vmatprep.mubr.msk.bf16.mxu1 %vm469_vm4, %v8958_v18 }
 0x530   : > { %6217 = vmatmul.mubr.msk.bf16.vlgmr.msra.gmra.mrb[0].mxu1 %vm469_vm4, %v8058_v51 }
 0x531   : > { %6249 = vmatpush3.bf16.msra.mxu1 %v4492_v25  ;;  %6220 = vmatprep.mubr.msk.bf16.mxu1 %vm469_vm4, %v8067_v29 }
 0x538   : > { %6221 = vmatmul.mubr.msk.bf16.gmra.mrb[4].mxu1 %vm469_vm4, %v8071_v28 }
 0x539   : > { %6224 = vmatprep.mubr.msk.bf16.mxu1 %vm469_vm4, %v8078_v1 }
 0x540   : > { %6225 = vmatmul.mubr.msk.bf16.gmra.mrb[8].mxu1 %vm469_vm4, %v8082_v61 }
 0x541   : > { %6228 = vmatprep.mubr.msk.bf16.mxu1 %vm469_vm4, %v8087_v44 }
 0x548   : > { %6229 = vmatmul.mubr.msk.bf16.gmra.mrb[12].mxu1 %vm469_vm4, %v8098_v38 }
 0x549   : > { %6232 = vmatprep.mubr.msk.bf16.mxu1 %vm469_vm4, %v8105_v21 }
 0x550   : > { %6233 = vmatmul.mubr.msk.bf16.gmra.mrb[16].mxu1 %vm469_vm4, %v8110_v41 }
 0x551   : > { %6236 = vmatprep.mubr.msk.bf16.mxu1 %vm469_vm4, %v8117_v32 }
 0x558   : > { %6237 = vmatmul.mubr.msk.bf16.gmra.mrb[20].mxu1 %vm469_vm4, %v8122_v9 }
 0x559   : > { %6240 = vmatprep.mubr.msk.bf16.mxu1 %vm469_vm4, %v8135_v24 }
 0x560   : > { %6241 = vmatmul.mubr.msk.bf16.gmra.mrb[24].mxu1 %vm469_vm4, %v8140_v8 }
 0x561   : > { %6244 = vmatprep.mubr.msk.bf16.mxu1 %vm469_vm4, %v8153_v4 }
 0x568   : > { %6245 = vmatmul.mubr.msk.bf16.gmra.mrb[28].mxu1 %vm469_vm4, %v8161_v3 }
 0x569   : > { %6250 = vmatprep.mubr.msk.bf16.mxu1 %vm469_vm4, %v8058_v51 }
 0x570   : > { %6251 = vmatmul.mubr.msk.bf16.vlgmr.msra.gmra.mrb[0].mxu1 %vm469_vm4, %v8067_v29 }
 0x571   : > { %6254 = vmatprep.mubr.msk.bf16.mxu1 %vm469_vm4, %v8071_v28 }
 0x578   : > { %6255 = vmatmul.mubr.msk.bf16.gmra.mrb[4].mxu1 %vm469_vm4, %v8078_v1 }
 0x579   : > { %6258 = vmatprep.mubr.msk.bf16.mxu1 %vm469_vm4, %v8082_v61 }
 0x580   : > { %6259 = vmatmul.mubr.msk.bf16.gmra.mrb[8].mxu1 %vm469_vm4, %v8087_v44 }
 0x581   : > { %6262 = vmatprep.mubr.msk.bf16.mxu1 %vm469_vm4, %v8098_v38 }
 0x588   : > { %6263 = vmatmul.mubr.msk.bf16.gmra.mrb[12].mxu1 %vm469_vm4, %v8105_v21 }
 0x589   : > { %6266 = vmatprep.mubr.msk.bf16.mxu1 %vm469_vm4, %v8110_v41 }
 0x590   : > { %6267 = vmatmul.mubr.msk.bf16.gmra.mrb[16].mxu1 %vm469_vm4, %v8117_v32 }
 0x591   : > { %6270 = vmatprep.mubr.msk.bf16.mxu1 %vm469_vm4, %v8122_v9 }
 0x598   : > { %6271 = vmatmul.mubr.msk.bf16.gmra.mrb[20].mxu1 %vm469_vm4, %v8135_v24 }
 0x599   : > { %6274 = vmatprep.mubr.msk.bf16.mxu1 %vm469_vm4, %v8140_v8 }
 0x5a0   : > { %6275 = vmatmul.mubr.msk.bf16.gmra.mrb[24].mxu1 %vm469_vm4, %v8153_v4 }
 0x5a1   : > { %6278 = vmatprep.mubr.msk.bf16.mxu1 %vm469_vm4, %v8161_v3 }
 0x5a8   : > { %6279 = vmatmul.mubr.msk.bf16.gmra.mrb[28].mxu1 %vm469_vm4, %v8153_v4 }
 0x643   : > { %v8477_v51 = vpop.f32.mrb[0].mxu1 }
 0x644   : > { %v8479_v56 = vpop.f32.mrb[1].mxu1  ;;  %v4758_v54 = vmul.f32 %v8477_v51, %v8477_v51  ;;  %v4690_v28 = vsel %vm469_vm4, %v8477_v51, 0.0 }
 0x645   : > { %v4756_v50 = vmul.f32 %v8479_v56, %v8479_v56  ;;  %v8483_v52 = vpop.f32.mrb[2].mxu1  ;;  %v4687_v55 = vsel %vm469_vm4, %v8479_v56, 0.0 }
 0x646   : > { %v8485_v49 = vpop.f32.mrb[3].mxu1  ;;  %v4759_v61 = vmul.f32 %v8483_v52, %v8483_v52  ;;  %v4791_v41 = vsel %vm469_vm4, %v4758_v54, 0.0  ;;  %v4692_v32 = vsel %vm469_vm4, %v8483_v52, 0.0 }
 0x647   : > { %v4688_v31 = vsel %vm469_vm4, %v8485_v49, 0.0  ;;  %v4757_v7 = vmul.f32 %v8485_v49, %v8485_v49  ;;  %v4788_v1 = vsel %vm469_vm4, %v4756_v50, 0.0 }
 0x648   : > { %v4689_v29 = vadd.f32 %v4688_v31, %v4687_v55  ;;  %v4793_v20 = vsel %vm469_vm4, %v4759_v61, 0.0 }
 0x649   : > { %v4789_v44 = vsel %vm469_vm4, %v4757_v7, 0.0 }
 0x64a   : > { %v4691_v38 = vadd.f32 %v4690_v28, %v4689_v29  ;;  %v4790_v21 = vadd.f32 %v4789_v44, %v4788_v1 }
 0x64b   : > { %v8504_v9 = vpop.f32.mrb[4].mxu1 }
 0x64c   : > { %v4792_v5 = vadd.f32 %v4791_v41, %v4790_v21  ;;  %v8506_v24 = vpop.f32.mrb[5].mxu1  ;;  %v4693_v8 = vadd.f32 %v4692_v32, %v4691_v38  ;;  %v4762_v12 = vmul.f32 %v8504_v9, %v8504_v9  ;;  %v4698_v37 = vsel %vm469_vm4, %v8504_v9, 0.0 }
 0x64d   : > { %v4694_v53 = vsel %vm469_vm4, %v8506_v24, 0.0  ;;  %v4760_v4 = vmul.f32 %v8506_v24, %v8506_v24  ;;  %v8513_v14 = vpop.f32.mrb[6].mxu1 }
 0x64e   : > { %v4695_v3 = vadd.f32 %v4694_v53, %v4693_v8  ;;  %v4794_v34 = vadd.f32 %v4793_v20, %v4792_v5  ;;  %v8515_v2 = vpop.f32.mrb[7].mxu1  ;;  %v4763_v22 = vmul.f32 %v8513_v14, %v8513_v14  ;;  %v4799_v10 = vsel %vm469_vm4, %v4762_v12, 0.0 }
 0x64f   : > { %v4795_v36 = vsel %vm469_vm4, %v4760_v4, 0.0  ;;  %v4696_v45 = vsel %vm469_vm4, %v8515_v2, 0.0  ;;  %v4761_v16 = vmul.f32 %v8515_v2, %v8515_v2  ;;  %v4700_v47 = vsel %vm469_vm4, %v8513_v14, 0.0 }
 0x650   : > { %v4796_v17 = vadd.f32 %v4795_v36, %v4794_v34  ;;  %v4697_v46 = vadd.f32 %v4696_v45, %v4695_v3  ;;  %v4801_v58 = vsel %vm469_vm4, %v4763_v22, 0.0 }
 0x651   : > { %v4797_v48 = vsel %vm469_vm4, %v4761_v16, 0.0 }
 0x652   : > { %v4699_v19 = vadd.f32 %v4698_v37, %v4697_v46  ;;  %v4798_v23 = vadd.f32 %v4797_v48, %v4796_v17 }
 0x653   : > { %v8532_v26 = vpop.f32.mrb[8].mxu1 }
 0x654   : > { %v4800_v30 = vadd.f32 %v4799_v10, %v4798_v23  ;;  %v8534_v40 = vpop.f32.mrb[9].mxu1  ;;  %v4701_v35 = vadd.f32 %v4700_v47, %v4699_v19  ;;  %v4766_v42 = vmul.f32 %v8532_v26, %v8532_v26  ;;  %v4706_v13 = vsel %vm469_vm4, %v8532_v26, 0.0 }
 0x655   : > { %v4702_v63 = vsel %vm469_vm4, %v8534_v40, 0.0  ;;  %v4764_v27 = vmul.f32 %v8534_v40, %v8534_v40  ;;  %v8541_v33 = vpop.f32.mrb[10].mxu1 }
 0x656   : > { %v4703_v62 = vadd.f32 %v4702_v63, %v4701_v35  ;;  %v4802_v6 = vadd.f32 %v4801_v58, %v4800_v30  ;;  %v8543_v11 = vpop.f32.mrb[11].mxu1  ;;  %v4767_v15 = vmul.f32 %v8541_v33, %v8541_v33  ;;  %v4807_v50 = vsel %vm469_vm4, %v4766_v42, 0.0 }
 0x657   : > { %v4803_v60 = vsel %vm469_vm4, %v4764_v27, 0.0  ;;  %v4704_v39 = vsel %vm469_vm4, %v8543_v11, 0.0  ;;  %v4765_v59 = vmul.f32 %v8543_v11, %v8543_v11  ;;  %v4708_v54 = vsel %vm469_vm4, %v8541_v33, 0.0 }
 0x658   : > { %v4804_v43 = vadd.f32 %v4803_v60, %v4802_v6  ;;  %v4705_v0 = vadd.f32 %v4704_v39, %v4703_v62  ;;  %v4809_v28 = vsel %vm469_vm4, %v4767_v15, 0.0 }
 0x659   : > { %v4805_v57 = vsel %vm469_vm4, %v4765_v59, 0.0 }
 0x65a   : > { %v4707_v18 = vadd.f32 %v4706_v13, %v4705_v0  ;;  %v4806_v25 = vadd.f32 %v4805_v57, %v4804_v43 }
 0x65b   : > { %v8560_v55 = vpop.f32.mrb[12].mxu1 }
 0x65c   : > { %v4808_v31 = vadd.f32 %v4807_v50, %v4806_v25  ;;  %v8562_v7 = vpop.f32.mrb[13].mxu1  ;;  %v4709_v29 = vadd.f32 %v4708_v54, %v4707_v18  ;;  %v4770_v32 = vmul.f32 %v8560_v55, %v8560_v55  ;;  %v4714_v3 = vsel %vm469_vm4, %v8560_v55, 0.0 }
 0x65d   : > { %v4710_v1 = vsel %vm469_vm4, %v8562_v7, 0.0  ;;  %v4768_v61 = vmul.f32 %v8562_v7, %v8562_v7  ;;  %v8569_v44 = vpop.f32.mrb[14].mxu1 }
 0x65e   : > { %v4711_v38 = vadd.f32 %v4710_v1, %v4709_v29  ;;  %v4810_v21 = vadd.f32 %v4809_v28, %v4808_v31  ;;  %v8571_v41 = vpop.f32.mrb[15].mxu1  ;;  %v4771_v34 = vmul.f32 %v8569_v44, %v8569_v44  ;;  %v4815_v16 = vsel %vm469_vm4, %v4770_v32, 0.0 }
 0x65f   : > { %v4811_v5 = vsel %vm469_vm4, %v4768_v61, 0.0  ;;  %v4712_v8 = vsel %vm469_vm4, %v8571_v41, 0.0  ;;  %v4769_v20 = vmul.f32 %v8571_v41, %v8571_v41  ;;  %v4716_v17 = vsel %vm469_vm4, %v8569_v44, 0.0 }
 0x660   : > { %v4812_v53 = vadd.f32 %v4811_v5, %v4810_v21  ;;  %v4713_v4 = vadd.f32 %v4712_v8, %v4711_v38  ;;  %v4817_v19 = vsel %vm469_vm4, %v4771_v34, 0.0 }
 0x661   : > { %v4813_v12 = vsel %vm469_vm4, %v4769_v20, 0.0 }
 0x662   : > { %v4715_v36 = vadd.f32 %v4714_v3, %v4713_v4  ;;  %v4814_v45 = vadd.f32 %v4813_v12, %v4812_v53 }
 0x663   : > { %v8588_v46 = vpop.f32.mrb[16].mxu1 }
 0x664   : > { %v4816_v37 = vadd.f32 %v4815_v16, %v4814_v45  ;;  %v8590_v22 = vpop.f32.mrb[17].mxu1  ;;  %v4717_v48 = vadd.f32 %v4716_v17, %v4715_v36  ;;  %v4774_v63 = vmul.f32 %v8588_v46, %v8588_v46  ;;  %v4722_v39 = vsel %vm469_vm4, %v8588_v46, 0.0 }
 0x665   : > { %v4718_v23 = vsel %vm469_vm4, %v8590_v22, 0.0  ;;  %v4772_v10 = vmul.f32 %v8590_v22, %v8590_v22  ;;  %v8597_v47 = vpop.f32.mrb[18].mxu1 }
 0x666   : > { %v4719_v30 = vadd.f32 %v4718_v23, %v4717_v48  ;;  %v4818_v35 = vadd.f32 %v4817_v19, %v4816_v37  ;;  %v8599_v58 = vpop.f32.mrb[19].mxu1  ;;  %v4775_v59 = vmul.f32 %v8597_v47, %v8597_v47  ;;  %v4823_v15 = vsel %vm469_vm4, %v4774_v63, 0.0 }
 0x667   : > { %v4819_v27 = vsel %vm469_vm4, %v4772_v10, 0.0  ;;  %v4720_v62 = vsel %vm469_vm4, %v8599_v58, 0.0  ;;  %v4773_v6 = vmul.f32 %v8599_v58, %v8599_v58  ;;  %v4724_v57 = vsel %vm469_vm4, %v8597_v47, 0.0 }
 0x668   : > { %v4820_v42 = vadd.f32 %v4819_v27, %v4818_v35  ;;  %v4721_v60 = vadd.f32 %v4720_v62, %v4719_v30  ;;  %v4825_v31 = vsel %vm469_vm4, %v4775_v59, 0.0 }
 0x669   : > { %v4821_v43 = vsel %vm469_vm4, %v4773_v6, 0.0 }
 0x66a   : > { %v4723_v0 = vadd.f32 %v4722_v39, %v4721_v60  ;;  %v4822_v13 = vadd.f32 %v4821_v43, %v4820_v42 }
 0x66b   : > { %v8616_v18 = vpop.f32.mrb[20].mxu1 }
 0x66c   : > { %v4824_v25 = vadd.f32 %v4823_v15, %v4822_v13  ;;  %v8618_v50 = vpop.f32.mrb[21].mxu1  ;;  %v4725_v54 = vadd.f32 %v4724_v57, %v4723_v0  ;;  %v4778_v32 = vmul.f32 %v8616_v18, %v8616_v18  ;;  %v4730_v3 = vsel %vm469_vm4, %v8616_v18, 0.0 }
 0x66d   : > { %v4726_v29 = vsel %vm469_vm4, %v8618_v50, 0.0  ;;  %v4776_v28 = vmul.f32 %v8618_v50, %v8618_v50  ;;  %v8625_v1 = vpop.f32.mrb[22].mxu1 }
 0x66e   : > { %v4727_v61 = vadd.f32 %v4726_v29, %v4725_v54  ;;  %v4826_v38 = vadd.f32 %v4825_v31, %v4824_v25  ;;  %v8627_v21 = vpop.f32.mrb[23].mxu1  ;;  %v4779_v34 = vmul.f32 %v8625_v1, %v8625_v1  ;;  %v4831_v16 = vsel %vm469_vm4, %v4778_v32, 0.0 }
 0x66f   : > { %v4827_v5 = vsel %vm469_vm4, %v4776_v28, 0.0  ;;  %v4728_v8 = vsel %vm469_vm4, %v8627_v21, 0.0  ;;  %v4777_v20 = vmul.f32 %v8627_v21, %v8627_v21  ;;  %v4732_v17 = vsel %vm469_vm4, %v8625_v1, 0.0 }
 0x670   : > { %v4828_v53 = vadd.f32 %v4827_v5, %v4826_v38  ;;  %v4729_v4 = vadd.f32 %v4728_v8, %v4727_v61  ;;  %v4833_v10 = vsel %vm469_vm4, %v4779_v34, 0.0 }
 0x671   : > { %v4829_v12 = vsel %vm469_vm4, %v4777_v20, 0.0 }
 0x672   : > { %v4731_v36 = vadd.f32 %v4730_v3, %v4729_v4  ;;  %v4830_v45 = vadd.f32 %v4829_v12, %v4828_v53 }
 0x673   : > { %v8644_v37 = vpop.f32.mrb[24].mxu1 }
 0x674   : > { %v4832_v48 = vadd.f32 %v4831_v16, %v4830_v45  ;;  %v8646_v19 = vpop.f32.mrb[25].mxu1  ;;  %v4733_v23 = vadd.f32 %v4732_v17, %v4731_v36  ;;  %v4782_v42 = vmul.f32 %v8644_v37, %v8644_v37  ;;  %v4738_v13 = vsel %vm469_vm4, %v8644_v37, 0.0 }
 0x675   : > { %v4734_v30 = vsel %vm469_vm4, %v8646_v19, 0.0  ;;  %v4780_v35 = vmul.f32 %v8646_v19, %v8646_v19  ;;  %v8653_v63 = vpop.f32.mrb[26].mxu1 }
 0x676   : > { %v4735_v27 = vadd.f32 %v4734_v30, %v4733_v23  ;;  %v4834_v62 = vadd.f32 %v4833_v10, %v4832_v48  ;;  %v8655_v6 = vpop.f32.mrb[27].mxu1  ;;  %v4783_v15 = vmul.f32 %v8653_v63, %v8653_v63  ;;  %v4839_v31 = vsel %vm469_vm4, %v4782_v42, 0.0 }
 0x677   : > { %v4835_v60 = vsel %vm469_vm4, %v4780_v35, 0.0  ;;  %v4736_v39 = vsel %vm469_vm4, %v8655_v6, 0.0  ;;  %v4781_v59 = vmul.f32 %v8655_v6, %v8655_v6  ;;  %v4740_v29 = vsel %vm469_vm4, %v8653_v63, 0.0 }
 0x678   : > { %v4836_v43 = vadd.f32 %v4835_v60, %v4834_v62  ;;  %v4737_v0 = vadd.f32 %v4736_v39, %v4735_v27  ;;  %v4841_v5 = vsel %vm469_vm4, %v4783_v15, 0.0 }
 0x679   : > { %v4837_v57 = vsel %vm469_vm4, %v4781_v59, 0.0 }
 0x67a   : > { %v4739_v25 = vadd.f32 %v4738_v13, %v4737_v0  ;;  %v4838_v54 = vadd.f32 %v4837_v57, %v4836_v43 }
 0x67b   : > { %v8672_v28 = vpop.f32.mrb[28].mxu1 }
 0x67c   : > { %v4840_v61 = vadd.f32 %v4839_v31, %v4838_v54  ;;  %v8674_v38 = vpop.f32.mrb[29].mxu1  ;;  %v4741_v32 = vadd.f32 %v4740_v29, %v4739_v25  ;;  %v4786_v12 = vmul.f32 %v8672_v28, %v8672_v28  ;;  %v4746_v23 = vsel %vm469_vm4, %v8672_v28, 0.0 }
 0x67d   : > { %v4742_v8 = vsel %vm469_vm4, %v8674_v38, 0.0  ;;  %v4784_v20 = vmul.f32 %v8674_v38, %v8674_v38  ;;  %v8681_v53 = vpop.f32.mrb[30].mxu1 }
 0x67e   : > { %v4743_v4 = vadd.f32 %v4742_v8, %v4741_v32  ;;  %v4842_v3 = vadd.f32 %v4841_v5, %v4840_v61  ;;  %v8683_v34 = vpop.f32.mrb[31].mxu1  ;;  %v4787_v10 = vmul.f32 %v8681_v53, %v8681_v53  ;;  %v4847_v62 = vsel %vm469_vm4, %v4786_v12, 0.0 }
 0x67f   : > { %v4843_v36 = vsel %vm469_vm4, %v4784_v20, 0.0  ;;  %v4744_v45 = vsel %vm469_vm4, %v8683_v34, 0.0  ;;  %v4785_v16 = vmul.f32 %v8683_v34, %v8683_v34  ;;  %v4748_v42 = vsel %vm469_vm4, %v8681_v53, 0.0 }
 0x680   : > { %v4844_v17 = vadd.f32 %v4843_v36, %v4842_v3  ;;  %v4745_v48 = vadd.f32 %v4744_v45, %v4743_v4  ;;  %v4849_v59 = vsel %vm469_vm4, %v4787_v10, 0.0 }
 0x681   : > { %v4845_v30 = vsel %vm469_vm4, %v4785_v16, 0.0 }
 0x682   : > { %v4747_v35 = vadd.f32 %v4746_v23, %v4745_v48  ;;  %v4846_v27 = vadd.f32 %v4845_v30, %v4844_v17 }
 0x684   : > { %v4749_v60 = vadd.f32 %v4748_v42, %v4747_v35  ;;  %v4848_v39 = vadd.f32 %v4847_v62, %v4846_v27 }
 0x686   : > { %v4750_v43 = vrot.slane %v4749_v60, 4  ;;  %v4850_v0 = vadd.f32 %v4849_v59, %v4848_v39 }
 0x688   : > { %v4751_v13 = vadd.f32 %v4750_v43, %v4749_v60  ;;  %v4851_v15 = vrot.slane %v4850_v0, 4 }
 0x68a   : > { %v4752_v57 = vrot.slane %v4751_v13, 2  ;;  %v4852_v25 = vadd.f32 %v4851_v15, %v4850_v0 }
 0x68c   : > { %v4753_v54 = vadd.f32 %v4752_v57, %v4751_v13  ;;  %v4853_v31 = vrot.slane %v4852_v25, 2 }
 0x68e   : > { %v4754_v29 = vrot.slane %v4753_v54, 1  ;;  %v4854_v61 = vadd.f32 %v4853_v31, %v4852_v25 }
 0x690   : > { %v4755_v32 = vadd.f32 %v4754_v29, %v4753_v54  ;;  %v4855_v5 = vrot.slane %v4854_v61, 1 }
 0x692   : > { %v4856_v8 = vadd.f32 %v4855_v5, %v4854_v61  ;;  %v8701_v20 = vmul.f32 0.00390625, %v4755_v32 }
 0x694   : > { %v4858_v4 = vmul.f32 0.00390625, %v4856_v8  ;;  %v4859_v3 = vmul.f32 %v8701_v20, %v8701_v20  ;;  %v4862_v12 = vsub.f32 %v8479_v56, %v8701_v20  ;;  %v4863_v36 = vsub.f32 %v8485_v49, %v8701_v20 }
 0x695   : > { %v4864_v45 = vsub.f32 %v8477_v51, %v8701_v20  ;;  %v4865_v16 = vsub.f32 %v8483_v52, %v8701_v20  ;;  %v4866_v17 = vsub.f32 %v8506_v24, %v8701_v20  ;;  %v4867_v48 = vsub.f32 %v8515_v2, %v8701_v20 }
 0x696   : > { %v4860_v23 = vsub.f32 %v4858_v4, %v4859_v3  ;;  %v4868_v10 = vsub.f32 %v8504_v9, %v8701_v20  ;;  %v4869_v56 = vsub.f32 %v8513_v14, %v8701_v20  ;;  %v4870_v49 = vsub.f32 %v8534_v40, %v8701_v20 }
 0x697   : > { %v4871_v51 = vsub.f32 %v8543_v11, %v8701_v20  ;;  %v4872_v52 = vsub.f32 %v8532_v26, %v8701_v20  ;;  %v4873_v24 = vsub.f32 %v8541_v33, %v8701_v20  ;;  %v4874_v2 = vsub.f32 %v8562_v7, %v8701_v20 }
 0x698   : > { %v4861_v30 = vmax.f32 %v4860_v23, 0.0  ;;  %v4875_v9 = vsub.f32 %v8571_v41, %v8701_v20  ;;  %v4876_v14 = vsub.f32 %v8560_v55, %v8701_v20  ;;  %v4877_v40 = vsub.f32 %v8569_v44, %v8701_v20  ;;  %v6825_v23 = vld [vmem:[%s6909_s21 + $0x8] sm:$0xff] }
 0x699   : > { %v4878_v11 = vsub.f32 %v8590_v22, %v8701_v20  ;;  %v4879_v26 = vsub.f32 %v8599_v58, %v8701_v20  ;;  %v4880_v33 = vsub.f32 %v8588_v46, %v8701_v20  ;;  %v4881_v7 = vsub.f32 %v8597_v47, %v8701_v20 }
 0x69a   : > { %v4882_v41 = vsub.f32 %v8618_v50, %v8701_v20  ;;  %v4883_v55 = vsub.f32 %v8627_v21, %v8701_v20  ;;  %v4884_v44 = vsub.f32 %v8616_v18, %v8701_v20  ;;  %v4885_v22 = vsub.f32 %v8625_v1, %v8701_v20 }
 0x69b   : > { %v4886_v58 = vsub.f32 %v8646_v19, %v8701_v20  ;;  %v4887_v46 = vsub.f32 %v8655_v6, %v8701_v20  ;;  %v4888_v47 = vsub.f32 %v8644_v37, %v8701_v20  ;;  %v4889_v50 = vsub.f32 %v8653_v63, %v8701_v20 }
 0x69c   : > { %v4890_v21 = vsub.f32 %v8674_v38, %v8701_v20  ;;  %v4891_v18 = vsub.f32 %v8683_v34, %v8701_v20  ;;  %v4892_v1 = vsub.f32 %v8672_v28, %v8701_v20  ;;  %v4893_v19 = vsub.f32 %v8681_v53, %v8701_v20 }
 0x69d   : > { %v4894_v35 = vadd.f32 1e-05, %v4861_v30  ;;  %v6829_v30 = vld [vmem:[%s6909_s21 + $0x28] sm:$0xff] }
 0x69f   : > { %6822 = vrsqrt.f32 %v4894_v35  ;;  %v6839_v35 = vld [vmem:[%s6909_s21 + $0x78] sm:$0xff] }
 0x6a9   : > { %v6823_v6 = vpop.eup %6822 }
 0x6aa   : > { %v4896_v27 = vmul.f32 %v6823_v6, %v4862_v12  ;;  %v4897_v37 = vmul.f32 %v6823_v6, %v4863_v36  ;;  %v4898_v62 = vmul.f32 %v6823_v6, %v4864_v45  ;;  %v4899_v42 = vmul.f32 %v6823_v6, %v4865_v16 }
 0x6ab   : > { %v4900_v63 = vmul.f32 %v6823_v6, %v4866_v17  ;;  %v4901_v60 = vmul.f32 %v6823_v6, %v4867_v48  ;;  %v4902_v39 = vmul.f32 %v6823_v6, %v4868_v10  ;;  %v4903_v38 = vmul.f32 %v6823_v6, %v4869_v56  ;;  %v6824_v17 = vld [vmem:[%s6909_s21] sm:$0xff]  ;;  %v6826_v56 = vld [vmem:[%s6909_s21 + $0x10] sm:$0xff] }
 0x6ac   : > { %v4904_v59 = vmul.f32 %v6823_v6, %v4870_v49  ;;  %v4905_v43 = vmul.f32 %v6823_v6, %v4871_v51  ;;  %v4906_v34 = vmul.f32 %v6823_v6, %v4872_v52  ;;  %v4907_v0 = vmul.f32 %v6823_v6, %v4873_v24  ;;  %v6827_v51 = vld [vmem:[%s6909_s21 + $0x18] sm:$0xff]  ;;  %v6828_v24 = vld [vmem:[%s6909_s21 + $0x20] sm:$0xff] }
 0x6ad   : > { %v4908_v13 = vmul.f32 %v6823_v6, %v4874_v2  ;;  %v4909_v28 = vmul.f32 %v6823_v6, %v4875_v9  ;;  %v4910_v15 = vmul.f32 %v6823_v6, %v4876_v14  ;;  %v4911_v53 = vmul.f32 %v6823_v6, %v4877_v40  ;;  %v6830_v14 = vld [vmem:[%s6909_s21 + $0x30] sm:$0xff] }
 0x6ae   : > { %v4912_v57 = vmul.f32 %v6823_v6, %v4878_v11  ;;  %v4913_v25 = vmul.f32 %v6823_v6, %v4879_v26  ;;  %v4914_v54 = vmul.f32 %v6823_v6, %v4880_v33  ;;  %v4915_v31 = vmul.f32 %v6823_v6, %v4881_v7  ;;  %v6831_v11 = vld [vmem:[%s6909_s21 + $0x38] sm:$0xff]  ;;  %v6832_v33 = vld [vmem:[%s6909_s21 + $0x40] sm:$0xff] }
 0x6af   : > { %v8769_v29 = vmul.f32 %v6823_v6, %v4882_v41  ;;  %v8771_v61 = vmul.f32 %v6823_v6, %v4883_v55  ;;  %v8773_v32 = vmul.f32 %v6823_v6, %v4884_v44  ;;  %v8775_v5 = vmul.f32 %v6823_v6, %v4885_v22  ;;  %v6833_v41 = vld [vmem:[%s6909_s21 + $0x48] sm:$0xff]  ;;  %v6834_v44 = vld [vmem:[%s6909_s21 + $0x50] sm:$0xff] }
 0x6b0   : > { %v8777_v8 = vmul.f32 %v6823_v6, %v4886_v58  ;;  %v8779_v20 = vmul.f32 %v6823_v6, %v4887_v46  ;;  %v8781_v4 = vmul.f32 %v6823_v6, %v4888_v47  ;;  %v8783_v3 = vmul.f32 %v6823_v6, %v4889_v50  ;;  %v6835_v58 = vld [vmem:[%s6909_s21 + $0x58] sm:$0xff]  ;;  %v6836_v47 = vld [vmem:[%s6909_s21 + $0x60] sm:$0xff] }
 0x6b1   : > { %v8792_v12 = vmul.f32 %v6823_v6, %v4890_v21  ;;  %v8794_v36 = vmul.f32 %v6823_v6, %v4891_v18  ;;  %v8796_v45 = vmul.f32 %v6823_v6, %v4892_v1  ;;  %v8798_v16 = vmul.f32 %v6823_v6, %v4893_v19  ;;  %v6837_v21 = vld [vmem:[%s6909_s21 + $0x68] sm:$0xff]  ;;  %v6838_v1 = vld [vmem:[%s6909_s21 + $0x70] sm:$0xff] }
 0x6b2   : > { %v4928_v48 = vadd.f32 %v6824_v17, %v4896_v27  ;;  %v4929_v10 = vadd.f32 %v6825_v23, %v4897_v37  ;;  %v4930_v49 = vadd.f32 %v6826_v56, %v4898_v62  ;;  %v4931_v52 = vadd.f32 %v6827_v51, %v4899_v42  ;;  %v6840_v27 = vld [vmem:[%s6909_s21 + $0x80] sm:$0xff]  ;;  %v6841_v62 = vld [vmem:[%s6909_s21 + $0x88] sm:$0xff]  ;;  %v6854_v17 = vld [vmem:[%s6909_s21 + $0xf0] sm:$0xff] }
 0x6b3   : > { %v4932_v2 = vadd.f32 %v6828_v24, %v4900_v63  ;;  %v4933_v9 = vadd.f32 %v6829_v30, %v4901_v60  ;;  %v4934_v40 = vadd.f32 %v6830_v14, %v4902_v39  ;;  %v4935_v26 = vadd.f32 %v6831_v11, %v4903_v38  ;;  %v6842_v63 = vld [vmem:[%s6909_s21 + $0x90] sm:$0xff]  ;;  %v6843_v39 = vld [vmem:[%s6909_s21 + $0x98] sm:$0xff] }
 0x6b4   : > { %v4936_v7 = vadd.f32 %v6832_v33, %v4904_v59  ;;  %v4937_v55 = vadd.f32 %v6833_v41, %v4905_v43  ;;  %v4938_v22 = vadd.f32 %v6834_v44, %v4906_v34  ;;  %v4939_v46 = vadd.f32 %v6835_v58, %v4907_v0  ;;  %4960 = vst.msk [vmem:[%s8790_s6] sm:$0xff] %vm469_vm4, %v4928_v48  ;;  %v6844_v59 = vld [vmem:[%s6909_s21 + $0xa0] sm:$0xff]  ;;  %v6845_v34 = vld [vmem:[%s6909_s21 + $0xa8] sm:$0xff]  ;;  %v6855_v23 = vld [vmem:[%s6909_s21 + $0xf8] sm:$0xff] }
 0x6b5   : > { %4961 = vst.msk [vmem:[%s8790_s6 + $0x8] sm:$0xff] %vm469_vm4, %v4929_v10  ;;  %4962 = vst.msk [vmem:[%s8790_s6 + $0x10] sm:$0xff] %vm469_vm4, %v4930_v49  ;;  %v4940_v50 = vadd.f32 %v6836_v47, %v4908_v13  ;;  %v4941_v18 = vadd.f32 %v6837_v21, %v4909_v28  ;;  %v4942_v19 = vadd.f32 %v6838_v1, %v4910_v15  ;;  %v6846_v13 = vld [vmem:[%s6909_s21 + $0xb0] sm:$0xff]  ;;  %v6847_v15 = vld [vmem:[%s6909_s21 + $0xb8] sm:$0xff] }
 0x6b6   : > { %4963 = vst.msk [vmem:[%s8790_s6 + $0x18] sm:$0xff] %vm469_vm4, %v4931_v52  ;;  %v4943_v6 = vadd.f32 %v6839_v35, %v4911_v53  ;;  %4964 = vst.msk [vmem:[%s8790_s6 + $0x20] sm:$0xff] %vm469_vm4, %v4932_v2  ;;  %v4944_v37 = vadd.f32 %v6840_v27, %v4912_v57  ;;  %v4945_v42 = vadd.f32 %v6841_v62, %v4913_v25  ;;  %v6848_v57 = vld [vmem:[%s6909_s21 + $0xc0] sm:$0xff] }
 0x6b7   : > { %4965 = vst.msk [vmem:[%s8790_s6 + $0x28] sm:$0xff] %vm469_vm4, %v4933_v9  ;;  %4966 = vst.msk [vmem:[%s8790_s6 + $0x30] sm:$0xff] %vm469_vm4, %v4934_v40  ;;  %v4946_v60 = vadd.f32 %v6842_v63, %v4914_v54  ;;  %v4947_v38 = vadd.f32 %v6843_v39, %v4915_v31  ;;  %v4948_v43 = vadd.f32 %v6844_v59, %v8769_v29  ;;  %v6849_v54 = vld [vmem:[%s6909_s21 + $0xc8] sm:$0xff]  ;;  %v6850_v29 = vld [vmem:[%s6909_s21 + $0xd0] sm:$0xff] }
 0x6b8   : > { %4967 = vst.msk [vmem:[%s8790_s6 + $0x38] sm:$0xff] %vm469_vm4, %v4935_v26  ;;  %4968 = vst.msk [vmem:[%s8790_s6 + $0x40] sm:$0xff] %vm469_vm4, %v4936_v7  ;;  %v4949_v0 = vadd.f32 %v6845_v34, %v8771_v61  ;;  %v4950_v28 = vadd.f32 %v6846_v13, %v8773_v32  ;;  %v4951_v53 = vadd.f32 %v6847_v15, %v8775_v5  ;;  %v6851_v32 = vld [vmem:[%s6909_s21 + $0xd8] sm:$0xff] }
 0x6b9   : > { %4969 = vst.msk [vmem:[%s8790_s6 + $0x48] sm:$0xff] %vm469_vm4, %v4937_v55  ;;  %4970 = vst.msk [vmem:[%s8790_s6 + $0x50] sm:$0xff] %vm469_vm4, %v4938_v22  ;;  %v4952_v25 = vadd.f32 %v6848_v57, %v8777_v8  ;;  %v4953_v31 = vadd.f32 %v6849_v54, %v8779_v20  ;;  %v4954_v61 = vadd.f32 %v6850_v29, %v8781_v4  ;;  %v6852_v8 = vld [vmem:[%s6909_s21 + $0xe0] sm:$0xff]  ;;  %v6853_v4 = vld [vmem:[%s6909_s21 + $0xe8] sm:$0xff] }
 0x6ba   : > { %4971 = vst.msk [vmem:[%s8790_s6 + $0x58] sm:$0xff] %vm469_vm4, %v4939_v46  ;;  %4972 = vst.msk [vmem:[%s8790_s6 + $0x60] sm:$0xff] %vm469_vm4, %v4940_v50  ;;  %v4955_v5 = vadd.f32 %v6851_v32, %v8783_v3  ;;  %v4956_v20 = vadd.f32 %v6852_v8, %v8792_v12  ;;  %v4957_v3 = vadd.f32 %v6853_v4, %v8794_v36 }
 0x6bb   : > { %4973 = vst.msk [vmem:[%s8790_s6 + $0x68] sm:$0xff] %vm469_vm4, %v4941_v18  ;;  %4974 = vst.msk [vmem:[%s8790_s6 + $0x70] sm:$0xff] %vm469_vm4, %v4942_v19  ;;  %v4958_v48 = vadd.f32 %v6854_v17, %v8796_v45  ;;  %v4959_v10 = vadd.f32 %v6855_v23, %v8798_v16 }
 0x6bc   : > { %4975 = vst.msk [vmem:[%s8790_s6 + $0x78] sm:$0xff] %vm469_vm4, %v4943_v6  ;;  %4976 = vst.msk [vmem:[%s8790_s6 + $0x80] sm:$0xff] %vm469_vm4, %v4944_v37 }
 0x6bd   : > { %4977 = vst.msk [vmem:[%s8790_s6 + $0x88] sm:$0xff] %vm469_vm4, %v4945_v42  ;;  %4978 = vst.msk [vmem:[%s8790_s6 + $0x90] sm:$0xff] %vm469_vm4, %v4946_v60 }
 0x6be   : > { %4979 = vst.msk [vmem:[%s8790_s6 + $0x98] sm:$0xff] %vm469_vm4, %v4947_v38  ;;  %4980 = vst.msk [vmem:[%s8790_s6 + $0xa0] sm:$0xff] %vm469_vm4, %v4948_v43 }
 0x6bf   : > { %4981 = vst.msk [vmem:[%s8790_s6 + $0xa8] sm:$0xff] %vm469_vm4, %v4949_v0  ;;  %4982 = vst.msk [vmem:[%s8790_s6 + $0xb0] sm:$0xff] %vm469_vm4, %v4950_v28 }
 0x6c0   : > { %4983 = vst.msk [vmem:[%s8790_s6 + $0xb8] sm:$0xff] %vm469_vm4, %v4951_v53  ;;  %4984 = vst.msk [vmem:[%s8790_s6 + $0xc0] sm:$0xff] %vm469_vm4, %v4952_v25 }
 0x6c1   : > { %4985 = vst.msk [vmem:[%s8790_s6 + $0xc8] sm:$0xff] %vm469_vm4, %v4953_v31  ;;  %4986 = vst.msk [vmem:[%s8790_s6 + $0xd0] sm:$0xff] %vm469_vm4, %v4954_v61 }
 0x6c2   : > { %4987 = vst.msk [vmem:[%s8790_s6 + $0xd8] sm:$0xff] %vm469_vm4, %v4955_v5  ;;  %4988 = vst.msk [vmem:[%s8790_s6 + $0xe0] sm:$0xff] %vm469_vm4, %v4956_v20 }
 0x6c3   : > { %4989 = vst.msk [vmem:[%s8790_s6 + $0xe8] sm:$0xff] %vm469_vm4, %v4957_v3  ;;  %4990 = vst.msk [vmem:[%s8790_s6 + $0xf0] sm:$0xff] %vm469_vm4, %v4958_v48 }
 0x6c4   : > { %4991 = vst.msk [vmem:[%s8790_s6 + $0xf8] sm:$0xff] %vm469_vm4, %v4959_v10 }
 0x6c5 PF: > { %s13_s12 = sadd.s32 1, %s6862_s12  }
 0x6c6   : > { %p10_p4 = scmp.ge.s32.totalorder %s13_s12, 4  }
 0x6c8   :  { %12 = sbr.rel (!%p10_p4) target bundleno = 1 (0x1), region = 78 }

</bundles_post_ra>
